<compile_context>
chip_gen: v6e
topology: v6e:2x2x1
jax: 0.10.0
libtpu: 0.0.40
codegen_flags: <defaults>
</compile_context>

<pallas_src>
import jax
import jax.numpy as jnp
from jax.experimental import pallas as pl
from jax.experimental.pallas import tpu as pltpu

_LANES = 128                       # logical rows packed per kernel row / output lane width
_MAX_K_FOR_KERNEL = 64             # block-diag weight is (128*K, 128); cap its VMEM cost
_TARGET_BLOCK_BYTES = 4 * 1024 * 1024


def _round_up(n, m):
    return ((n + m - 1) // m) * m


def _linear_out_kernel(x_ref, w_ref, b_ref, o_ref):
    # x_ref: (TR, 128*K) VMEM    w_ref: (128*K, 128) VMEM (grid-resident)
    # b_ref: (1, 1) SMEM         o_ref: (TR, 128) VMEM (lane-dense)
    acc = jnp.dot(x_ref[...], w_ref[...], preferred_element_type=jnp.float32)
    o_ref[...] = (acc + b_ref[0, 0]).astype(o_ref.dtype)


def _xla_linear(x2d, weight, bias, out_dtype):
    out = x2d.astype(jnp.float32) @ weight.astype(jnp.float32).reshape(-1, 1)
    return (out + bias.astype(jnp.float32).reshape(())).astype(out_dtype)


def _pick_block_rows(mp, requested, row_bytes):
    """Packed rows per grid step (each packed row = 128 logical rows)."""
    if requested is None:
        requested = max(8, _TARGET_BLOCK_BYTES // row_bytes)   # ~4 MiB input blocks
    tr = max(8, (requested // 8) * 8)                          # sublane-aligned
    # >= 2 grid steps when possible so ("parallel",) shards across v7x's 2 TCs.
    tr = min(tr, _round_up(pl.cdiv(mp, 2), 8))
    if tr >= mp:
        tr = mp                                                # single full-extent block
    return tr


def nn_original_gravity_forward(vX, weight, bias, *, block_rows=None,
                                min_pallas_bytes=2 * 1024 * 1024):
    """Pallas implementation of NN_OriginalGravity.forward (Linear(dim_input, 1)).

    vX:     (..., dim_input)  float32 or bfloat16
    weight: (dim_input, 1)    (transposed vs. torch's (1, dim_input) layout)
    bias:   (1, 1)
    returns (..., 1) in vX.dtype
    """
    *lead, K = vX.shape
    M = 1
    for d in lead:
        M *= d
    out_dtype = vX.dtype
    x2d = vX.reshape(M, K)

    in_bytes = M * K * jnp.dtype(vX.dtype).itemsize
    m_main = (M // _LANES) * _LANES
    if in_bytes < min_pallas_bytes or m_main == 0 or K > _MAX_K_FOR_KERNEL:
        # vreg-scale problems / unsupported K: plain XLA is strictly faster here.
        # TODO(synk): dedicated pack=1 kernel for dim_input > 64 if ever needed.
        return _xla_linear(x2d, weight, bias, out_dtype).reshape(*lead, 1)

    m_tail = M - m_main                 # <= 127 remainder rows
    mp = m_main // _LANES               # packed rows fed to the kernel
    kp = _LANES * K                     # lanes per packed row
    compute_dtype = vX.dtype

    # Main body: free contiguous reshape to the packed (mp, 128*K) view.
    # (The leading-rows slice is only taken in the ragged case.)
    x_main = x2d if m_tail == 0 else jax.lax.slice_in_dim(x2d, 0, m_main, axis=0)
    x_eff = x_main.reshape(mp, kp)

    # Block-diagonal weight: w_eff[j*K + d, j] = w[d]  ->  lane-dense MXU output.
    w_vec = weight.reshape(K).astype(compute_dtype)
    eye = jnp.eye(_LANES, dtype=compute_dtype)
    w_eff = (eye[:, None, :] * w_vec[None, :, None]).reshape(kp, _LANES)

    b_smem = jnp.asarray(bias, jnp.float32).reshape(1, 1)

    row_bytes = kp * jnp.dtype(compute_dtype).itemsize
    tr = _pick_block_rows(mp, block_rows, row_bytes)
    grid = (pl.cdiv(mp, tr),)           # ragged last block is masked by Pallas

    out2d = pl.pallas_call(
        _linear_out_kernel,
        out_shape=jax.ShapeDtypeStruct((mp, _LANES), out_dtype),
        grid=grid,
        in_specs=[
            pl.BlockSpec((tr, kp), lambda i: (i, 0)),
            pl.BlockSpec((kp, _LANES), lambda i: (0, 0)),       # grid-resident weight
            pl.BlockSpec(memory_space=pltpu.MemorySpace.SMEM),  # bias scalar
        ],
        out_specs=pl.BlockSpec((tr, _LANES), lambda i: (i, 0)),
        compiler_params=pltpu.CompilerParams(
            dimension_semantics=("parallel",),   # row tiles are independent
            vmem_limit_bytes=40 * 1024 * 1024,
        ),
    )(x_eff, w_eff, b_smem)

    out_main = out2d.reshape(m_main, 1)          # free contiguous reshape
    if m_tail:
        # <=127 remainder rows: tiny XLA matvec on a tiny slice (no big pad/copy).
        x_tail = jax.lax.slice_in_dim(x2d, m_main, M, axis=0)
        out_tail = _xla_linear(x_tail, weight, bias, out_dtype)
        out = jnp.concatenate([out_main, out_tail], axis=0)
    else:
        out = out_main
    return out.reshape(*lead, 1)


if __name__ == "__main__":
    # Shapes implied by get_X_T: X is [n_origins, n_destinations, dim_input].
    dim_input = 32
    key = jax.random.PRNGKey(0)
    kw, kb, k1, k2, k3 = jax.random.split(key, 5)

    # Deterministic params mimicking torch.nn.Linear default init:
    # U(-1/sqrt(dim_input), 1/sqrt(dim_input)).
    bound = 1.0 / (dim_input ** 0.5)
    weight = jax.random.uniform(kw, (dim_input, 1), jnp.float32, -bound, bound)
    bias = jax.random.uniform(kb, (1, 1), jnp.float32, -bound, bound)

    def ref_fn(vx):
        return (vx.reshape(-1, dim_input) @ weight + bias[0, 0]).reshape(
            *vx.shape[:-1], 1)

    # 1) Typical tiny OD matrix -> automatic XLA bypass path.
    vx1 = jax.random.normal(k1, (2, 8, dim_input), jnp.float32)
    o1 = jax.block_until_ready(nn_original_gravity_forward(vx1, weight, bias))
    assert o1.shape == (2, 8, 1)
    assert jnp.allclose(o1, ref_fn(vx1), atol=1e-4, rtol=1e-4)

    # 2) Pallas path: 128-row aligned, single block, no tail.
    vx2 = jax.random.normal(k2, (8, 128, dim_input), jnp.float32)      # M = 1024
    o2 = jax.block_until_ready(
        nn_original_gravity_forward(vx2, weight, bias, min_pallas_bytes=0))
    assert o2.shape == (8, 128, 1)
    assert jnp.allclose(o2, ref_fn(vx2), atol=1e-4, rtol=1e-4)

    # 3) Pallas path: multi-step grid with ragged last block + XLA tail row.
    vx3 = jax.random.normal(k3, (5, 333, dim_input), jnp.float32)      # M = 1665
    o3 = jax.block_until_ready(
        nn_original_gravity_forward(vx3, weight, bias,
                                    min_pallas_bytes=0, block_rows=8))
    assert o3.shape == (5, 333, 1)
    assert jnp.allclose(o3, ref_fn(vx3), atol=1e-4, rtol=1e-4)

    print("KERNEL_OK")
</pallas_src>

<mosaic_0001>
module attributes {stable_mosaic.version = 11 : i64} {
  func.func @_linear_out_kernel(%arg0: i32, %arg1: memref<8x4096xf32, #tpu.memory_space<vmem>>, %arg2: memref<4096x128xf32, #tpu.memory_space<vmem>>, %arg3: memref<1x1xf32, #tpu.memory_space<smem>>, %arg4: memref<8x128xf32, #tpu.memory_space<vmem>>) attributes {dimension_semantics = [#tpu.dimension_semantics<parallel>], iteration_bounds = array<i64: 1>, scalar_prefetch = 0 : i64, scratch_operands = 0 : i64, tpu.core_type = #tpu.core_type<tc>, window_params = [{transform_indices = @transform_0, window_bounds = array<i64: 8, 4096>}, {pipeline_mode = #tpu.pipeline_mode<synchronous>, transform_indices = @transform_1, window_bounds = array<i64: 4096, 128>}, {transform_indices = @transform_2, window_bounds = array<i64: 1, 1>}, {transform_indices = @transform_3, window_bounds = array<i64: 8, 128>}]} {
    %c0 = arith.constant 0 : index
    %c0_0 = arith.constant 0 : index
    %0 = vector.load %arg1[%c0, %c0_0] : memref<8x4096xf32, #tpu.memory_space<vmem>>, vector<8x4096xf32>
    %c0_1 = arith.constant 0 : index
    %c0_2 = arith.constant 0 : index
    %1 = vector.load %arg2[%c0_1, %c0_2] : memref<4096x128xf32, #tpu.memory_space<vmem>>, vector<4096x128xf32>
    %cst = arith.constant dense<0.000000e+00> : vector<8x128xf32>
    %2 = tpu.matmul %0, %1, %cst {dimension_numbers = #tpu.dot_dimension_numbers<[1], [0], [0], [1], [0, 0, 1, 1], [], []>} : vector<8x4096xf32>, vector<4096x128xf32>, vector<8x128xf32> -> vector<8x128xf32>
    %c0_3 = arith.constant 0 : index
    %c0_4 = arith.constant 0 : index
    %3 = memref.load %arg3[%c0_3, %c0_4] : memref<1x1xf32, #tpu.memory_space<smem>>
    %4 = vector.broadcast %3 : f32 to vector<8x128xf32>
    %5 = arith.addf %2, %4 : vector<8x128xf32>
    %c0_5 = arith.constant 0 : index
    %c0_6 = arith.constant 0 : index
    %6 = vector.load %arg4[%c0_5, %c0_6] : memref<8x128xf32, #tpu.memory_space<vmem>>, vector<8x128xf32>
    tpu.vector_store %arg4[%c0_5, %c0_6], %5 {strides = array<i32>} : memref<8x128xf32, #tpu.memory_space<vmem>>, vector<8x128xf32>,
    return
  }
  func.func @transform_0(%arg0: i32) -> (i32, i32) {
    %c0_i32 = arith.constant 0 : i32
    %c0_i32_0 = arith.constant 0 : i32
    return %arg0, %c0_i32 : i32, i32
  }
  func.func @transform_1(%arg0: i32) -> (i32, i32) {
    %c0_i32 = arith.constant 0 : i32
    %c0_i32_0 = arith.constant 0 : i32
    %c0_i32_1 = arith.constant 0 : i32
    return %c0_i32, %c0_i32_0 : i32, i32
  }
  func.func @transform_2(%arg0: i32) -> (i32, i32) {
    %c0_i32 = arith.constant 0 : i32
    %c0_i32_0 = arith.constant 0 : i32
    %c0_i32_1 = arith.constant 0 : i32
    return %c0_i32, %c0_i32_0 : i32, i32
  }
  func.func @transform_3(%arg0: i32) -> (i32, i32) {
    %c0_i32 = arith.constant 0 : i32
    %c0_i32_0 = arith.constant 0 : i32
    return %arg0, %c0_i32 : i32, i32
  }
}

</mosaic_0001>

<bundles_post_ra>
// kernel: tpu_custom_call.1
= control target key start
LH: loop header
LB: loop body
LE: loop exit
PB: predicated region body
PF: predicated region fallthrough
CT: control target
= control target key end

     0   :  { %9 = vsyncpa [#allocation4], 0  ;;  %s2393_s0 = inlined_call_operand.hbm [shape: f32[8,4096], index: 0, kind: input, shape index: {}]   ;;  %s2394_s1 = inlined_call_operand.hbm [shape: f32[4096,128], index: 1, kind: input, shape index: {}]   ;;  %s2395_s2 = inlined_call_operand.<no memory space> [shape: f32[1,1], index: 2, kind: input, shape index: {}]   ;;  %s2396_s3 = inlined_call_operand.hbm [shape: f32[8,128], index: 3, kind: output, shape index: {}]  }
   0x1   :  { %10 = vsyncpa [#allocation7], 0 }
   0x2   :  { %11 = vsyncpa [#allocation5], 0  ;;  %s2356_s12 = smov [#allocation3]   ;;  %s2357_s14 = smov [#allocation6]  }
   0x3   :  { %s18_s13 = sshll.u32 %s2356_s12, 4  ;;  %s27_s15 = sshll.u32 %s2357_s14, 4  ;;  %s19_s13 = int_to_ptr.vmem [resolvable:$true] %s18_s13  ;;  %s28_s15 = int_to_ptr.vmem [resolvable:$true] %s27_s15 }
   0x4   :  { %s2298_s16 = scalar_lea.vmem %s19_s13, 4096  ;;  %p2303_p1 = scmp.lt.s32.totalorder %s19_s13, %s19_s13 }
   0x5   :  { %p2299_p0 = scmp.ne.s32.totalorder %s19_s13, %s2298_s16  ;;  %p2304_p2 = scmp.lt.s32.totalorder %s2298_s16, %s2298_s16 }
   0x7   :  { %p2305_p3 = por %p2304_p2, %p2303_p1 }
   0x9   :  { %p2306_p4 = pnand %p2305_p3, %p2299_p0 }
   0xb   :  { %2309 = shalt.err (!%p2306_p4)
}
   0xc   :  { %21 = dma.hbm_to_vmem [thread:$0]  %s2393_s0, 4096, %s19_s13, [#allocation4]  }
   0xd   :  { %s2318_s19 = scalar_lea.vmem %s28_s15, 65536  ;;  %p2323_p6 = scmp.lt.s32.totalorder %s28_s15, %s28_s15 }
   0xe   :  { %p2319_p5 = scmp.ne.s32.totalorder %s28_s15, %s2318_s19  ;;  %p2324_p7 = scmp.lt.s32.totalorder %s2318_s19, %s2318_s19 }
  0x10   :  { %p2325_p8 = por %p2324_p7, %p2323_p6 }
  0x12   :  { %p2326_p9 = pnand %p2325_p8, %p2319_p5 }
  0x14   :  { %2329 = shalt.err (!%p2326_p9)
}
  0x15   :  { %s2358_s20 = smov 128   ;;  %s2359_s21 = smov 8  }
  0x16   :  { %33 = dma.hbm_to_vmem [thread:$0]  %s2394_s1, 65536, %s28_s15, [#allocation7], %s2358_s20, %s2358_s20, %s2359_s21  }
  0x17   :  { %2350 = dma.done.wait [#allocation4], 4096  }
  0x18   :  { %2351 = vsyncadd [#allocation4], 4294963200 }
  0x19   :  { %2352 = dma.done.wait [#allocation7], 65536  }
  0x1a   :  { %2353 = vsyncadd [#allocation7], 4294901760  ;;  %v105_v0 = vld [vmem:[#allocation6 + $0xf8] sm:$0xff]  ;;  %v104_v4 = vld [vmem:[#allocation6 + $0xf0] sm:$0xff] }
  0x1b   :  { %v137_v1 = vld [vmem:[#allocation6 + $0x1f8] sm:$0xff]  ;;  %1725 = vmatprep.subr.mxu0 %v105_v0  ;;  %v136_v5 = vld [vmem:[#allocation6 + $0x1f0] sm:$0xff]  ;;  %v103_v8 = vld [vmem:[#allocation6 + $0xe8] sm:$0xff] }
  0x1c   :  { %v89_v2 = vld [vmem:[#allocation6 + $0x78] sm:$0xff]  ;;  %1760 = vmatprep.subr.mxu1 %v137_v1  ;;  %v88_v6 = vld [vmem:[#allocation6 + $0x70] sm:$0xff]  ;;  %v135_v9 = vld [vmem:[#allocation6 + $0x1e8] sm:$0xff] }
  0x1d   :  { %v121_v3 = vld [vmem:[#allocation6 + $0x178] sm:$0xff]  ;;  %1726 = vmatpush3.msra.mxu0 %v89_v2  ;;  %v120_v7 = vld [vmem:[#allocation6 + $0x170] sm:$0xff]  ;;  %v87_v10 = vld [vmem:[#allocation6 + $0x68] sm:$0xff] }
  0x1e   :  { %1761 = vmatpush3.msra.mxu1 %v121_v3  ;;  %1727 = vmatprep.subr.mxu0 %v104_v4  ;;  %v119_v11 = vld [vmem:[#allocation6 + $0x168] sm:$0xff]  ;;  %v102_v12 = vld [vmem:[#allocation6 + $0xe0] sm:$0xff]  ;;  %v101_v16 = vld [vmem:[#allocation6 + $0xd8] sm:$0xff] }
  0x1f   :  { %1762 = vmatprep.subr.mxu1 %v136_v5  ;;  %1728 = vmatpush3.msra.mxu0 %v88_v6  ;;  %v134_v13 = vld [vmem:[#allocation6 + $0x1e0] sm:$0xff]  ;;  %v133_v17 = vld [vmem:[#allocation6 + $0x1d8] sm:$0xff]  ;;  %v100_v20 = vld [vmem:[#allocation6 + $0xd0] sm:$0xff] }
  0x20   :  { %1763 = vmatpush3.msra.mxu1 %v120_v7  ;;  %1729 = vmatprep.subr.mxu0 %v103_v8  ;;  %v86_v14 = vld [vmem:[#allocation6 + $0x60] sm:$0xff]  ;;  %v85_v18 = vld [vmem:[#allocation6 + $0x58] sm:$0xff]  ;;  %v132_v21 = vld [vmem:[#allocation6 + $0x1d0] sm:$0xff] }
  0x21   :  { %1764 = vmatprep.subr.mxu1 %v135_v9  ;;  %v118_v15 = vld [vmem:[#allocation6 + $0x160] sm:$0xff]  ;;  %1730 = vmatpush3.msra.mxu0 %v87_v10  ;;  %v117_v19 = vld [vmem:[#allocation6 + $0x158] sm:$0xff]  ;;  %v84_v22 = vld [vmem:[#allocation6 + $0x50] sm:$0xff] }
  0x22   :  { %1765 = vmatpush3.msra.mxu1 %v119_v11  ;;  %1731 = vmatprep.subr.mxu0 %v102_v12  ;;  %v116_v23 = vld [vmem:[#allocation6 + $0x150] sm:$0xff]  ;;  %v99_v24 = vld [vmem:[#allocation6 + $0xc8] sm:$0xff]  ;;  %v98_v28 = vld [vmem:[#allocation6 + $0xc0] sm:$0xff] }
  0x23   :  { %1766 = vmatprep.subr.mxu1 %v134_v13  ;;  %1732 = vmatpush3.msra.mxu0 %v86_v14  ;;  %v131_v25 = vld [vmem:[#allocation6 + $0x1c8] sm:$0xff]  ;;  %v130_v29 = vld [vmem:[#allocation6 + $0x1c0] sm:$0xff]  ;;  %v97_v32 = vld [vmem:[#allocation6 + $0xb8] sm:$0xff] }
  0x24   :  { %1767 = vmatpush3.msra.mxu1 %v118_v15  ;;  %1733 = vmatprep.subr.mxu0 %v101_v16  ;;  %v83_v26 = vld [vmem:[#allocation6 + $0x48] sm:$0xff]  ;;  %v82_v30 = vld [vmem:[#allocation6 + $0x40] sm:$0xff]  ;;  %v129_v33 = vld [vmem:[#allocation6 + $0x1b8] sm:$0xff] }
  0x25   :  { %1768 = vmatprep.subr.mxu1 %v133_v17  ;;  %1734 = vmatpush3.msra.mxu0 %v85_v18  ;;  %v115_v27 = vld [vmem:[#allocation6 + $0x148] sm:$0xff]  ;;  %v114_v31 = vld [vmem:[#allocation6 + $0x140] sm:$0xff]  ;;  %v81_v34 = vld [vmem:[#allocation6 + $0x38] sm:$0xff] }
  0x26   :  { %1769 = vmatpush3.msra.mxu1 %v117_v19  ;;  %1735 = vmatprep.subr.mxu0 %v100_v20  ;;  %v113_v35 = vld [vmem:[#allocation6 + $0x138] sm:$0xff]  ;;  %v96_v36 = vld [vmem:[#allocation6 + $0xb0] sm:$0xff]  ;;  %v95_v40 = vld [vmem:[#allocation6 + $0xa8] sm:$0xff] }
  0x27   :  { %1770 = vmatprep.subr.mxu1 %v132_v21  ;;  %1736 = vmatpush3.msra.mxu0 %v84_v22  ;;  %v128_v37 = vld [vmem:[#allocation6 + $0x1b0] sm:$0xff]  ;;  %v127_v41 = vld [vmem:[#allocation6 + $0x1a8] sm:$0xff]  ;;  %v94_v44 = vld [vmem:[#allocation6 + $0xa0] sm:$0xff] }
  0x28   :  { %1771 = vmatpush3.msra.mxu1 %v116_v23  ;;  %1737 = vmatprep.subr.mxu0 %v99_v24  ;;  %v80_v38 = vld [vmem:[#allocation6 + $0x30] sm:$0xff]  ;;  %v79_v42 = vld [vmem:[#allocation6 + $0x28] sm:$0xff]  ;;  %v126_v45 = vld [vmem:[#allocation6 + $0x1a0] sm:$0xff] }
  0x29   :  { %1772 = vmatprep.subr.mxu1 %v131_v25  ;;  %1738 = vmatpush3.msra.mxu0 %v83_v26  ;;  %v112_v39 = vld [vmem:[#allocation6 + $0x130] sm:$0xff]  ;;  %v111_v43 = vld [vmem:[#allocation6 + $0x128] sm:$0xff]  ;;  %v78_v46 = vld [vmem:[#allocation6 + $0x20] sm:$0xff] }
  0x2a   :  { %1773 = vmatpush3.msra.mxu1 %v115_v27  ;;  %1739 = vmatprep.subr.mxu0 %v98_v28  ;;  %v110_v47 = vld [vmem:[#allocation6 + $0x120] sm:$0xff]  ;;  %v93_v48 = vld [vmem:[#allocation6 + $0x98] sm:$0xff]  ;;  %v92_v52 = vld [vmem:[#allocation6 + $0x90] sm:$0xff] }
  0x2b   :  { %1774 = vmatprep.subr.mxu1 %v130_v29  ;;  %1740 = vmatpush3.msra.mxu0 %v82_v30  ;;  %v125_v49 = vld [vmem:[#allocation6 + $0x198] sm:$0xff]  ;;  %v124_v53 = vld [vmem:[#allocation6 + $0x190] sm:$0xff]  ;;  %v91_v56 = vld [vmem:[#allocation6 + $0x88] sm:$0xff] }
  0x2c   :  { %1775 = vmatpush3.msra.mxu1 %v114_v31  ;;  %1741 = vmatprep.subr.mxu0 %v97_v32  ;;  %v77_v50 = vld [vmem:[#allocation6 + $0x18] sm:$0xff]  ;;  %v76_v54 = vld [vmem:[#allocation6 + $0x10] sm:$0xff]  ;;  %v123_v57 = vld [vmem:[#allocation6 + $0x188] sm:$0xff] }
  0x2d   :  { %1776 = vmatprep.subr.mxu1 %v129_v33  ;;  %1742 = vmatpush3.msra.mxu0 %v81_v34  ;;  %v109_v51 = vld [vmem:[#allocation6 + $0x118] sm:$0xff]  ;;  %v108_v55 = vld [vmem:[#allocation6 + $0x110] sm:$0xff]  ;;  %v75_v58 = vld [vmem:[#allocation6 + $0x8] sm:$0xff] }
  0x2e   :  { %1777 = vmatpush3.msra.mxu1 %v113_v35  ;;  %1743 = vmatprep.subr.mxu0 %v96_v36  ;;  %v107_v59 = vld [vmem:[#allocation6 + $0x108] sm:$0xff]  ;;  %v90_v60 = vld [vmem:[#allocation6 + $0x80] sm:$0xff]  ;;  %v45_v2 = vld [vmem:[#allocation3 + $0x18] sm:$0xff] }
  0x2f   :  { %1778 = vmatprep.subr.mxu1 %v128_v37  ;;  %1744 = vmatpush3.msra.mxu0 %v80_v38  ;;  %v122_v61 = vld [vmem:[#allocation6 + $0x180] sm:$0xff]  ;;  %v43_v63 = vld [vmem:[#allocation3 + $0x8] sm:$0xff]  ;;  %v169_v3 = vld [vmem:[#allocation6 + $0x2f8] sm:$0xff] }
  0x30   :  { %1779 = vmatpush3.msra.mxu1 %v112_v39  ;;  %1745 = vmatprep.subr.mxu0 %v95_v40  ;;  %v74_v62 = vld [vmem:[#allocation6] sm:$0xff]  ;;  %v201_v4 = vld [vmem:[#allocation6 + $0x3f8] sm:$0xff]  ;;  %v44_v5 = vld [vmem:[#allocation3 + $0x10] sm:$0xff] }
  0x31   :  { %1780 = vmatprep.subr.mxu1 %v127_v41  ;;  %1746 = vmatpush3.msra.mxu0 %v79_v42  ;;  %v106_v0 = vld [vmem:[#allocation6 + $0x100] sm:$0xff]  ;;  %v153_v6 = vld [vmem:[#allocation6 + $0x278] sm:$0xff]  ;;  %v168_v8 = vld [vmem:[#allocation6 + $0x2f0] sm:$0xff] }
  0x32   :  { %1781 = vmatpush3.msra.mxu1 %v111_v43  ;;  %1747 = vmatprep.subr.mxu0 %v94_v44  ;;  %v42_v1 = vld [vmem:[#allocation3] sm:$0xff]  ;;  %v185_v7 = vld [vmem:[#allocation6 + $0x378] sm:$0xff]  ;;  %v200_v9 = vld [vmem:[#allocation6 + $0x3f0] sm:$0xff] }
  0x33   :  { %1782 = vmatprep.subr.mxu1 %v126_v45  ;;  %1748 = vmatpush3.msra.mxu0 %v78_v46  ;;  %v152_v10 = vld [vmem:[#allocation6 + $0x270] sm:$0xff]  ;;  %v167_v12 = vld [vmem:[#allocation6 + $0x2e8] sm:$0xff]  ;;  %v166_v16 = vld [vmem:[#allocation6 + $0x2e0] sm:$0xff] }
  0x34   :  { %1783 = vmatpush3.msra.mxu1 %v110_v47  ;;  %1749 = vmatprep.subr.mxu0 %v93_v48  ;;  %v184_v11 = vld [vmem:[#allocation6 + $0x370] sm:$0xff]  ;;  %v199_v13 = vld [vmem:[#allocation6 + $0x3e8] sm:$0xff]  ;;  %v198_v17 = vld [vmem:[#allocation6 + $0x3e0] sm:$0xff] }
  0x35   :  { %1784 = vmatprep.subr.mxu1 %v125_v49  ;;  %1750 = vmatpush3.msra.mxu0 %v77_v50  ;;  %v151_v14 = vld [vmem:[#allocation6 + $0x268] sm:$0xff]  ;;  %v150_v18 = vld [vmem:[#allocation6 + $0x260] sm:$0xff]  ;;  %v165_v20 = vld [vmem:[#allocation6 + $0x2d8] sm:$0xff] }
  0x36   :  { %1785 = vmatpush3.msra.mxu1 %v109_v51  ;;  %1751 = vmatprep.subr.mxu0 %v92_v52  ;;  %v183_v15 = vld [vmem:[#allocation6 + $0x368] sm:$0xff]  ;;  %v182_v19 = vld [vmem:[#allocation6 + $0x360] sm:$0xff]  ;;  %v197_v21 = vld [vmem:[#allocation6 + $0x3d8] sm:$0xff] }
  0x37   :  { %1786 = vmatprep.subr.mxu1 %v124_v53  ;;  %1752 = vmatpush3.msra.mxu0 %v76_v54  ;;  %v149_v22 = vld [vmem:[#allocation6 + $0x258] sm:$0xff]  ;;  %v164_v24 = vld [vmem:[#allocation6 + $0x2d0] sm:$0xff]  ;;  %v163_v28 = vld [vmem:[#allocation6 + $0x2c8] sm:$0xff] }
  0x38   :  { %1787 = vmatpush3.msra.mxu1 %v108_v55  ;;  %1753 = vmatprep.subr.mxu0 %v91_v56  ;;  %v181_v23 = vld [vmem:[#allocation6 + $0x358] sm:$0xff]  ;;  %v196_v25 = vld [vmem:[#allocation6 + $0x3d0] sm:$0xff]  ;;  %v195_v29 = vld [vmem:[#allocation6 + $0x3c8] sm:$0xff] }
  0x39   :  { %1788 = vmatprep.subr.mxu1 %v123_v57  ;;  %1754 = vmatpush3.msra.mxu0 %v75_v58  ;;  %v148_v26 = vld [vmem:[#allocation6 + $0x250] sm:$0xff]  ;;  %v147_v30 = vld [vmem:[#allocation6 + $0x248] sm:$0xff]  ;;  %v162_v32 = vld [vmem:[#allocation6 + $0x2c0] sm:$0xff] }
  0x3a   :  { %1789 = vmatpush3.msra.mxu1 %v107_v59  ;;  %1755 = vmatprep.subr.mxu0 %v90_v60  ;;  %v180_v27 = vld [vmem:[#allocation6 + $0x350] sm:$0xff]  ;;  %v179_v31 = vld [vmem:[#allocation6 + $0x348] sm:$0xff]  ;;  %v194_v33 = vld [vmem:[#allocation6 + $0x3c0] sm:$0xff] }
  0x3b   :  { %1790 = vmatprep.subr.mxu1 %v122_v61  ;;  %1756 = vmatpush3.msra.mxu0 %v74_v62  ;;  %v146_v34 = vld [vmem:[#allocation6 + $0x240] sm:$0xff]  ;;  %v161_v36 = vld [vmem:[#allocation6 + $0x2b8] sm:$0xff]  ;;  %v160_v40 = vld [vmem:[#allocation6 + $0x2b0] sm:$0xff] }
  0x3c   :  { %652 = vmatprep.mubr.f32.mxu0 %v43_v63  ;;  %1791 = vmatpush3.msra.mxu1 %v106_v0  ;;  %v178_v35 = vld [vmem:[#allocation6 + $0x340] sm:$0xff]  ;;  %v193_v37 = vld [vmem:[#allocation6 + $0x3b8] sm:$0xff]  ;;  %v192_v41 = vld [vmem:[#allocation6 + $0x3b0] sm:$0xff] }
  0x3d   :  { %653 = vmatmul.mubr.f32.vlgmr.msra.gmra.mxu0 %v42_v1  ;;  %722 = vmatprep.mubr.f32.mxu1 %v45_v2  ;;  %v145_v38 = vld [vmem:[#allocation6 + $0x238] sm:$0xff]  ;;  %v144_v42 = vld [vmem:[#allocation6 + $0x230] sm:$0xff]  ;;  %v159_v44 = vld [vmem:[#allocation6 + $0x2a8] sm:$0xff] }
  0x3e   :  { %1795 = vmatprep.subr.mxu0 %v169_v3  ;;  %1830 = vmatprep.subr.mxu1 %v201_v4  ;;  %v177_v39 = vld [vmem:[#allocation6 + $0x338] sm:$0xff]  ;;  %v176_v43 = vld [vmem:[#allocation6 + $0x330] sm:$0xff]  ;;  %v191_v45 = vld [vmem:[#allocation6 + $0x3a8] sm:$0xff] }
  0x3f   :  { %723 = vmatmul.mubr.f32.vlgmr.msra.gmra.mxu1 %v44_v5  ;;  %1796 = vmatpush3.msra.mxu0 %v153_v6  ;;  %v143_v46 = vld [vmem:[#allocation6 + $0x228] sm:$0xff]  ;;  %v158_v48 = vld [vmem:[#allocation6 + $0x2a0] sm:$0xff]  ;;  %v157_v52 = vld [vmem:[#allocation6 + $0x298] sm:$0xff] }
  0x40   :  { %1831 = vmatpush3.msra.mxu1 %v185_v7  ;;  %1797 = vmatprep.subr.mxu0 %v168_v8  ;;  %v175_v47 = vld [vmem:[#allocation6 + $0x328] sm:$0xff]  ;;  %v190_v49 = vld [vmem:[#allocation6 + $0x3a0] sm:$0xff]  ;;  %v189_v53 = vld [vmem:[#allocation6 + $0x398] sm:$0xff] }
  0x41   :  { %1832 = vmatprep.subr.mxu1 %v200_v9  ;;  %1798 = vmatpush3.msra.mxu0 %v152_v10  ;;  %v142_v50 = vld [vmem:[#allocation6 + $0x220] sm:$0xff]  ;;  %v141_v54 = vld [vmem:[#allocation6 + $0x218] sm:$0xff]  ;;  %v156_v56 = vld [vmem:[#allocation6 + $0x290] sm:$0xff] }
  0x42   :  { %1833 = vmatpush3.msra.mxu1 %v184_v11  ;;  %1799 = vmatprep.subr.mxu0 %v167_v12  ;;  %v174_v51 = vld [vmem:[#allocation6 + $0x320] sm:$0xff]  ;;  %v173_v55 = vld [vmem:[#allocation6 + $0x318] sm:$0xff]  ;;  %v188_v57 = vld [vmem:[#allocation6 + $0x390] sm:$0xff] }
  0x43   :  { %1834 = vmatprep.subr.mxu1 %v199_v13  ;;  %1800 = vmatpush3.msra.mxu0 %v151_v14  ;;  %v140_v58 = vld [vmem:[#allocation6 + $0x210] sm:$0xff]  ;;  %v155_v60 = vld [vmem:[#allocation6 + $0x288] sm:$0xff]  ;;  %v154_v0 = vld [vmem:[#allocation6 + $0x280] sm:$0xff] }
  0x44   :  { %1835 = vmatpush3.msra.mxu1 %v183_v15  ;;  %1801 = vmatprep.subr.mxu0 %v166_v16  ;;  %v172_v59 = vld [vmem:[#allocation6 + $0x310] sm:$0xff]  ;;  %v187_v61 = vld [vmem:[#allocation6 + $0x388] sm:$0xff]  ;;  %v186_v1 = vld [vmem:[#allocation6 + $0x380] sm:$0xff] }
  0x45   :  { %1836 = vmatprep.subr.mxu1 %v198_v17  ;;  %1802 = vmatpush3.msra.mxu0 %v150_v18  ;;  %v139_v62 = vld [vmem:[#allocation6 + $0x208] sm:$0xff]  ;;  %v138_v2 = vld [vmem:[#allocation6 + $0x200] sm:$0xff]  ;;  %v49_v6 = vld [vmem:[#allocation3 + $0x38] sm:$0xff] }
  0x46   :  { %1837 = vmatpush3.msra.mxu1 %v182_v19  ;;  %1803 = vmatprep.subr.mxu0 %v165_v20  ;;  %v171_v63 = vld [vmem:[#allocation6 + $0x308] sm:$0xff]  ;;  %v170_v4 = vld [vmem:[#allocation6 + $0x300] sm:$0xff]  ;;  %v233_v7 = vld [vmem:[#allocation6 + $0x4f8] sm:$0xff] }
  0x47   :  { %1838 = vmatprep.subr.mxu1 %v197_v21  ;;  %1804 = vmatpush3.msra.mxu0 %v149_v22  ;;  %v47_v3 = vld [vmem:[#allocation3 + $0x28] sm:$0xff]  ;;  %v46_v5 = vld [vmem:[#allocation3 + $0x20] sm:$0xff]  ;;  %v265_v8 = vld [vmem:[#allocation6 + $0x5f8] sm:$0xff] }
  0x48   :  { %1839 = vmatpush3.msra.mxu1 %v181_v23  ;;  %1805 = vmatprep.subr.mxu0 %v164_v24  ;;  %v48_v9 = vld [vmem:[#allocation3 + $0x30] sm:$0xff]  ;;  %v217_v10 = vld [vmem:[#allocation6 + $0x478] sm:$0xff]  ;;  %v231_v16 = vld [vmem:[#allocation6 + $0x4e8] sm:$0xff] }
  0x49   :  { %1840 = vmatprep.subr.mxu1 %v196_v25  ;;  %1806 = vmatpush3.msra.mxu0 %v148_v26  ;;  %v249_v11 = vld [vmem:[#allocation6 + $0x578] sm:$0xff]  ;;  %v232_v12 = vld [vmem:[#allocation6 + $0x4f0] sm:$0xff]  ;;  %v263_v17 = vld [vmem:[#allocation6 + $0x5e8] sm:$0xff] }
  0x4a   :  { %1841 = vmatpush3.msra.mxu1 %v180_v27  ;;  %1807 = vmatprep.subr.mxu0 %v163_v28  ;;  %v264_v13 = vld [vmem:[#allocation6 + $0x5f0] sm:$0xff]  ;;  %v215_v18 = vld [vmem:[#allocation6 + $0x468] sm:$0xff]  ;;  %v230_v20 = vld [vmem:[#allocation6 + $0x4e0] sm:$0xff] }
  0x4b   :  { %1842 = vmatprep.subr.mxu1 %v195_v29  ;;  %1808 = vmatpush3.msra.mxu0 %v147_v30  ;;  %v216_v14 = vld [vmem:[#allocation6 + $0x470] sm:$0xff]  ;;  %v247_v19 = vld [vmem:[#allocation6 + $0x568] sm:$0xff]  ;;  %v262_v21 = vld [vmem:[#allocation6 + $0x5e0] sm:$0xff] }
  0x4c   :  { %1843 = vmatpush3.msra.mxu1 %v179_v31  ;;  %1809 = vmatprep.subr.mxu0 %v162_v32  ;;  %v248_v15 = vld [vmem:[#allocation6 + $0x570] sm:$0xff]  ;;  %v214_v22 = vld [vmem:[#allocation6 + $0x460] sm:$0xff]  ;;  %v229_v24 = vld [vmem:[#allocation6 + $0x4d8] sm:$0xff] }
  0x4d   :  { %1844 = vmatprep.subr.mxu1 %v194_v33  ;;  %1810 = vmatpush3.msra.mxu0 %v146_v34  ;;  %v246_v23 = vld [vmem:[#allocation6 + $0x560] sm:$0xff]  ;;  %v261_v25 = vld [vmem:[#allocation6 + $0x5d8] sm:$0xff]  ;;  %v228_v28 = vld [vmem:[#allocation6 + $0x4d0] sm:$0xff] }
  0x4e   :  { %1845 = vmatpush3.msra.mxu1 %v178_v35  ;;  %1811 = vmatprep.subr.mxu0 %v161_v36  ;;  %v213_v26 = vld [vmem:[#allocation6 + $0x458] sm:$0xff]  ;;  %v260_v29 = vld [vmem:[#allocation6 + $0x5d0] sm:$0xff]  ;;  %v227_v32 = vld [vmem:[#allocation6 + $0x4c8] sm:$0xff] }
  0x4f   :  { %1846 = vmatprep.subr.mxu1 %v193_v37  ;;  %1812 = vmatpush3.msra.mxu0 %v145_v38  ;;  %v245_v27 = vld [vmem:[#allocation6 + $0x558] sm:$0xff]  ;;  %v212_v30 = vld [vmem:[#allocation6 + $0x450] sm:$0xff]  ;;  %v259_v33 = vld [vmem:[#allocation6 + $0x5c8] sm:$0xff] }
  0x50   :  { %1847 = vmatpush3.msra.mxu1 %v177_v39  ;;  %1813 = vmatprep.subr.mxu0 %v160_v40  ;;  %v244_v31 = vld [vmem:[#allocation6 + $0x550] sm:$0xff]  ;;  %v211_v34 = vld [vmem:[#allocation6 + $0x448] sm:$0xff]  ;;  %v226_v36 = vld [vmem:[#allocation6 + $0x4c0] sm:$0xff] }
  0x51   :  { %1848 = vmatprep.subr.mxu1 %v192_v41  ;;  %1814 = vmatpush3.msra.mxu0 %v144_v42  ;;  %v243_v35 = vld [vmem:[#allocation6 + $0x548] sm:$0xff]  ;;  %v258_v37 = vld [vmem:[#allocation6 + $0x5c0] sm:$0xff]  ;;  %v225_v40 = vld [vmem:[#allocation6 + $0x4b8] sm:$0xff] }
  0x52   :  { %1849 = vmatpush3.msra.mxu1 %v176_v43  ;;  %1815 = vmatprep.subr.mxu0 %v159_v44  ;;  %v210_v38 = vld [vmem:[#allocation6 + $0x440] sm:$0xff]  ;;  %v257_v41 = vld [vmem:[#allocation6 + $0x5b8] sm:$0xff]  ;;  %v224_v44 = vld [vmem:[#allocation6 + $0x4b0] sm:$0xff] }
  0x53   :  { %1850 = vmatprep.subr.mxu1 %v191_v45  ;;  %1816 = vmatpush3.msra.mxu0 %v143_v46  ;;  %v242_v39 = vld [vmem:[#allocation6 + $0x540] sm:$0xff]  ;;  %v209_v42 = vld [vmem:[#allocation6 + $0x438] sm:$0xff]  ;;  %v256_v45 = vld [vmem:[#allocation6 + $0x5b0] sm:$0xff] }
  0x54   :  { %1851 = vmatpush3.msra.mxu1 %v175_v47  ;;  %1817 = vmatprep.subr.mxu0 %v158_v48  ;;  %v241_v43 = vld [vmem:[#allocation6 + $0x538] sm:$0xff]  ;;  %v208_v46 = vld [vmem:[#allocation6 + $0x430] sm:$0xff]  ;;  %v223_v48 = vld [vmem:[#allocation6 + $0x4a8] sm:$0xff] }
  0x55   :  { %1852 = vmatprep.subr.mxu1 %v190_v49  ;;  %1818 = vmatpush3.msra.mxu0 %v142_v50  ;;  %v240_v47 = vld [vmem:[#allocation6 + $0x530] sm:$0xff]  ;;  %v255_v49 = vld [vmem:[#allocation6 + $0x5a8] sm:$0xff] }
  0x56   :  { %1853 = vmatpush3.msra.mxu1 %v174_v51  ;;  %1819 = vmatprep.subr.mxu0 %v157_v52  ;;  %v207_v50 = vld [vmem:[#allocation6 + $0x428] sm:$0xff]  ;;  %v222_v52 = vld [vmem:[#allocation6 + $0x4a0] sm:$0xff] }
  0x57   :  { %1854 = vmatprep.subr.mxu1 %v189_v53  ;;  %1820 = vmatpush3.msra.mxu0 %v141_v54  ;;  %v239_v51 = vld [vmem:[#allocation6 + $0x528] sm:$0xff]  ;;  %v254_v53 = vld [vmem:[#allocation6 + $0x5a0] sm:$0xff] }
  0x58   :  { %1855 = vmatpush3.msra.mxu1 %v173_v55  ;;  %1821 = vmatprep.subr.mxu0 %v156_v56  ;;  %v206_v54 = vld [vmem:[#allocation6 + $0x420] sm:$0xff]  ;;  %v221_v56 = vld [vmem:[#allocation6 + $0x498] sm:$0xff] }
  0x59   :  { %1856 = vmatprep.subr.mxu1 %v188_v57  ;;  %1822 = vmatpush3.msra.mxu0 %v140_v58  ;;  %v238_v55 = vld [vmem:[#allocation6 + $0x520] sm:$0xff]  ;;  %v253_v57 = vld [vmem:[#allocation6 + $0x598] sm:$0xff] }
  0x5a   :  { %1857 = vmatpush3.msra.mxu1 %v172_v59  ;;  %1823 = vmatprep.subr.mxu0 %v155_v60  ;;  %v205_v58 = vld [vmem:[#allocation6 + $0x418] sm:$0xff]  ;;  %v220_v60 = vld [vmem:[#allocation6 + $0x490] sm:$0xff] }
  0x5b   :  { %1858 = vmatprep.subr.mxu1 %v187_v61  ;;  %1824 = vmatpush3.msra.mxu0 %v139_v62  ;;  %v237_v59 = vld [vmem:[#allocation6 + $0x518] sm:$0xff]  ;;  %v252_v61 = vld [vmem:[#allocation6 + $0x590] sm:$0xff] }
  0x5c   :  { %1859 = vmatpush3.msra.mxu1 %v171_v63  ;;  %1825 = vmatprep.subr.mxu0 %v154_v0  ;;  %v204_v62 = vld [vmem:[#allocation6 + $0x410] sm:$0xff]  ;;  %v219_v0 = vld [vmem:[#allocation6 + $0x488] sm:$0xff] }
  0x5d   :  { %1860 = vmatprep.subr.mxu1 %v186_v1  ;;  %1826 = vmatpush3.msra.mxu0 %v138_v2  ;;  %v236_v63 = vld [vmem:[#allocation6 + $0x510] sm:$0xff]  ;;  %v251_v1 = vld [vmem:[#allocation6 + $0x588] sm:$0xff] }
  0x5e   :  { %792 = vmatprep.mubr.f32.mxu0 %v47_v3  ;;  %1861 = vmatpush3.msra.mxu1 %v170_v4  ;;  %v203_v2 = vld [vmem:[#allocation6 + $0x408] sm:$0xff]  ;;  %v218_v4 = vld [vmem:[#allocation6 + $0x480] sm:$0xff] }
  0x5f   :  { %793 = vmatmul.mubr.f32.vlgmr.msra.gmra.mxu0 %v46_v5  ;;  %862 = vmatprep.mubr.f32.mxu1 %v49_v6  ;;  %v235_v3 = vld [vmem:[#allocation6 + $0x508] sm:$0xff]  ;;  %v250_v5 = vld [vmem:[#allocation6 + $0x580] sm:$0xff] }
  0x60   :  { %1865 = vmatprep.subr.mxu0 %v233_v7  ;;  %1900 = vmatprep.subr.mxu1 %v265_v8  ;;  %v202_v6 = vld [vmem:[#allocation6 + $0x400] sm:$0xff]  ;;  %v51_v7 = vld [vmem:[#allocation3 + $0x48] sm:$0xff] }
  0x61   :  { %863 = vmatmul.mubr.f32.vlgmr.msra.gmra.mxu1 %v48_v9  ;;  %1866 = vmatpush3.msra.mxu0 %v217_v10  ;;  %v234_v8 = vld [vmem:[#allocation6 + $0x500] sm:$0xff]  ;;  %v53_v10 = vld [vmem:[#allocation3 + $0x58] sm:$0xff] }
  0x62   :  { %1901 = vmatpush3.msra.mxu1 %v249_v11  ;;  %1867 = vmatprep.subr.mxu0 %v232_v12  ;;  %v50_v9 = vld [vmem:[#allocation3 + $0x40] sm:$0xff]  ;;  %v297_v11 = vld [vmem:[#allocation6 + $0x6f8] sm:$0xff] }
  0x63   :  { %1902 = vmatprep.subr.mxu1 %v264_v13  ;;  %1868 = vmatpush3.msra.mxu0 %v216_v14  ;;  %v329_v12 = vld [vmem:[#allocation6 + $0x7f8] sm:$0xff]  ;;  %v52_v13 = vld [vmem:[#allocation3 + $0x50] sm:$0xff] }
  0x64   :  { %1903 = vmatpush3.msra.mxu1 %v248_v15  ;;  %1869 = vmatprep.subr.mxu0 %v231_v16  ;;  %v281_v14 = vld [vmem:[#allocation6 + $0x678] sm:$0xff]  ;;  %v296_v16 = vld [vmem:[#allocation6 + $0x6f0] sm:$0xff] }
  0x65   :  { %1904 = vmatprep.subr.mxu1 %v263_v17  ;;  %1870 = vmatpush3.msra.mxu0 %v215_v18  ;;  %v313_v15 = vld [vmem:[#allocation6 + $0x778] sm:$0xff]  ;;  %v328_v17 = vld [vmem:[#allocation6 + $0x7f0] sm:$0xff] }
  0x66   :  { %1905 = vmatpush3.msra.mxu1 %v247_v19  ;;  %1871 = vmatprep.subr.mxu0 %v230_v20  ;;  %v280_v18 = vld [vmem:[#allocation6 + $0x670] sm:$0xff]  ;;  %v295_v20 = vld [vmem:[#allocation6 + $0x6e8] sm:$0xff] }
  0x67   :  { %1906 = vmatprep.subr.mxu1 %v262_v21  ;;  %1872 = vmatpush3.msra.mxu0 %v214_v22  ;;  %v312_v19 = vld [vmem:[#allocation6 + $0x770] sm:$0xff]  ;;  %v327_v21 = vld [vmem:[#allocation6 + $0x7e8] sm:$0xff] }
  0x68   :  { %1907 = vmatpush3.msra.mxu1 %v246_v23  ;;  %1873 = vmatprep.subr.mxu0 %v229_v24  ;;  %v279_v22 = vld [vmem:[#allocation6 + $0x668] sm:$0xff]  ;;  %v294_v24 = vld [vmem:[#allocation6 + $0x6e0] sm:$0xff] }
  0x69   :  { %1908 = vmatprep.subr.mxu1 %v261_v25  ;;  %1874 = vmatpush3.msra.mxu0 %v213_v26  ;;  %v311_v23 = vld [vmem:[#allocation6 + $0x768] sm:$0xff]  ;;  %v326_v25 = vld [vmem:[#allocation6 + $0x7e0] sm:$0xff] }
  0x6a   :  { %1909 = vmatpush3.msra.mxu1 %v245_v27  ;;  %1875 = vmatprep.subr.mxu0 %v228_v28  ;;  %v278_v26 = vld [vmem:[#allocation6 + $0x660] sm:$0xff]  ;;  %v293_v28 = vld [vmem:[#allocation6 + $0x6d8] sm:$0xff] }
  0x6b   :  { %1910 = vmatprep.subr.mxu1 %v260_v29  ;;  %1876 = vmatpush3.msra.mxu0 %v212_v30  ;;  %v310_v27 = vld [vmem:[#allocation6 + $0x760] sm:$0xff]  ;;  %v325_v29 = vld [vmem:[#allocation6 + $0x7d8] sm:$0xff] }
  0x6c   :  { %1911 = vmatpush3.msra.mxu1 %v244_v31  ;;  %1877 = vmatprep.subr.mxu0 %v227_v32  ;;  %v277_v30 = vld [vmem:[#allocation6 + $0x658] sm:$0xff]  ;;  %v292_v32 = vld [vmem:[#allocation6 + $0x6d0] sm:$0xff] }
  0x6d   :  { %1912 = vmatprep.subr.mxu1 %v259_v33  ;;  %1878 = vmatpush3.msra.mxu0 %v211_v34  ;;  %v309_v31 = vld [vmem:[#allocation6 + $0x758] sm:$0xff]  ;;  %v324_v33 = vld [vmem:[#allocation6 + $0x7d0] sm:$0xff] }
  0x6e   :  { %1913 = vmatpush3.msra.mxu1 %v243_v35  ;;  %1879 = vmatprep.subr.mxu0 %v226_v36  ;;  %v276_v34 = vld [vmem:[#allocation6 + $0x650] sm:$0xff]  ;;  %v291_v36 = vld [vmem:[#allocation6 + $0x6c8] sm:$0xff] }
  0x6f   :  { %1914 = vmatprep.subr.mxu1 %v258_v37  ;;  %1880 = vmatpush3.msra.mxu0 %v210_v38  ;;  %v308_v35 = vld [vmem:[#allocation6 + $0x750] sm:$0xff]  ;;  %v323_v37 = vld [vmem:[#allocation6 + $0x7c8] sm:$0xff] }
  0x70   :  { %1915 = vmatpush3.msra.mxu1 %v242_v39  ;;  %1881 = vmatprep.subr.mxu0 %v225_v40  ;;  %v275_v38 = vld [vmem:[#allocation6 + $0x648] sm:$0xff]  ;;  %v290_v40 = vld [vmem:[#allocation6 + $0x6c0] sm:$0xff] }
  0x71   :  { %1916 = vmatprep.subr.mxu1 %v257_v41  ;;  %1882 = vmatpush3.msra.mxu0 %v209_v42  ;;  %v307_v39 = vld [vmem:[#allocation6 + $0x748] sm:$0xff]  ;;  %v322_v41 = vld [vmem:[#allocation6 + $0x7c0] sm:$0xff] }
  0x72   :  { %1917 = vmatpush3.msra.mxu1 %v241_v43  ;;  %1883 = vmatprep.subr.mxu0 %v224_v44  ;;  %v274_v42 = vld [vmem:[#allocation6 + $0x640] sm:$0xff]  ;;  %v289_v44 = vld [vmem:[#allocation6 + $0x6b8] sm:$0xff] }
  0x73   :  { %1918 = vmatprep.subr.mxu1 %v256_v45  ;;  %1884 = vmatpush3.msra.mxu0 %v208_v46  ;;  %v306_v43 = vld [vmem:[#allocation6 + $0x740] sm:$0xff]  ;;  %v321_v45 = vld [vmem:[#allocation6 + $0x7b8] sm:$0xff] }
  0x74   :  { %1919 = vmatpush3.msra.mxu1 %v240_v47  ;;  %1885 = vmatprep.subr.mxu0 %v223_v48  ;;  %v273_v46 = vld [vmem:[#allocation6 + $0x638] sm:$0xff]  ;;  %v288_v48 = vld [vmem:[#allocation6 + $0x6b0] sm:$0xff] }
  0x75   :  { %1920 = vmatprep.subr.mxu1 %v255_v49  ;;  %1886 = vmatpush3.msra.mxu0 %v207_v50  ;;  %v305_v47 = vld [vmem:[#allocation6 + $0x738] sm:$0xff]  ;;  %v320_v49 = vld [vmem:[#allocation6 + $0x7b0] sm:$0xff] }
  0x76   :  { %1921 = vmatpush3.msra.mxu1 %v239_v51  ;;  %1887 = vmatprep.subr.mxu0 %v222_v52  ;;  %v272_v50 = vld [vmem:[#allocation6 + $0x630] sm:$0xff]  ;;  %v287_v52 = vld [vmem:[#allocation6 + $0x6a8] sm:$0xff] }
  0x77   :  { %1922 = vmatprep.subr.mxu1 %v254_v53  ;;  %1888 = vmatpush3.msra.mxu0 %v206_v54  ;;  %v304_v51 = vld [vmem:[#allocation6 + $0x730] sm:$0xff]  ;;  %v319_v53 = vld [vmem:[#allocation6 + $0x7a8] sm:$0xff] }
  0x78   :  { %1923 = vmatpush3.msra.mxu1 %v238_v55  ;;  %1889 = vmatprep.subr.mxu0 %v221_v56  ;;  %v271_v54 = vld [vmem:[#allocation6 + $0x628] sm:$0xff]  ;;  %v286_v56 = vld [vmem:[#allocation6 + $0x6a0] sm:$0xff] }
  0x79   :  { %1924 = vmatprep.subr.mxu1 %v253_v57  ;;  %1890 = vmatpush3.msra.mxu0 %v205_v58  ;;  %v303_v55 = vld [vmem:[#allocation6 + $0x728] sm:$0xff]  ;;  %v318_v57 = vld [vmem:[#allocation6 + $0x7a0] sm:$0xff] }
  0x7a   :  { %1925 = vmatpush3.msra.mxu1 %v237_v59  ;;  %1891 = vmatprep.subr.mxu0 %v220_v60  ;;  %v270_v58 = vld [vmem:[#allocation6 + $0x620] sm:$0xff]  ;;  %v285_v60 = vld [vmem:[#allocation6 + $0x698] sm:$0xff] }
  0x7b   :  { %1926 = vmatprep.subr.mxu1 %v252_v61  ;;  %1892 = vmatpush3.msra.mxu0 %v204_v62  ;;  %v302_v59 = vld [vmem:[#allocation6 + $0x720] sm:$0xff]  ;;  %v317_v61 = vld [vmem:[#allocation6 + $0x798] sm:$0xff] }
  0x7c   :  { %1927 = vmatpush3.msra.mxu1 %v236_v63  ;;  %1893 = vmatprep.subr.mxu0 %v219_v0  ;;  %v269_v62 = vld [vmem:[#allocation6 + $0x618] sm:$0xff]  ;;  %v284_v0 = vld [vmem:[#allocation6 + $0x690] sm:$0xff] }
  0x7d   :  { %1928 = vmatprep.subr.mxu1 %v251_v1  ;;  %1894 = vmatpush3.msra.mxu0 %v203_v2  ;;  %v301_v63 = vld [vmem:[#allocation6 + $0x718] sm:$0xff]  ;;  %v316_v1 = vld [vmem:[#allocation6 + $0x790] sm:$0xff] }
  0x7e   :  { %1929 = vmatpush3.msra.mxu1 %v235_v3  ;;  %1895 = vmatprep.subr.mxu0 %v218_v4  ;;  %v268_v2 = vld [vmem:[#allocation6 + $0x610] sm:$0xff]  ;;  %v283_v4 = vld [vmem:[#allocation6 + $0x688] sm:$0xff] }
  0x7f   :  { %1930 = vmatprep.subr.mxu1 %v250_v5  ;;  %1896 = vmatpush3.msra.mxu0 %v202_v6  ;;  %v300_v3 = vld [vmem:[#allocation6 + $0x710] sm:$0xff]  ;;  %v315_v5 = vld [vmem:[#allocation6 + $0x788] sm:$0xff] }
  0x80   :  { %932 = vmatprep.mubr.f32.mxu0 %v51_v7  ;;  %1931 = vmatpush3.msra.mxu1 %v234_v8  ;;  %v267_v6 = vld [vmem:[#allocation6 + $0x608] sm:$0xff]  ;;  %v282_v8 = vld [vmem:[#allocation6 + $0x680] sm:$0xff] }
  0x81   :  { %933 = vmatmul.mubr.f32.vlgmr.msra.gmra.mxu0 %v50_v9  ;;  %1002 = vmatprep.mubr.f32.mxu1 %v53_v10  ;;  %v299_v7 = vld [vmem:[#allocation6 + $0x708] sm:$0xff]  ;;  %v314_v9 = vld [vmem:[#allocation6 + $0x780] sm:$0xff] }
  0x82   :  { %1935 = vmatprep.subr.mxu0 %v297_v11  ;;  %1970 = vmatprep.subr.mxu1 %v329_v12  ;;  %v266_v10 = vld [vmem:[#allocation6 + $0x600] sm:$0xff]  ;;  %v55_v11 = vld [vmem:[#allocation3 + $0x68] sm:$0xff] }
  0x83   :  { %1003 = vmatmul.mubr.f32.vlgmr.msra.gmra.mxu1 %v52_v13  ;;  %1936 = vmatpush3.msra.mxu0 %v281_v14  ;;  %v298_v12 = vld [vmem:[#allocation6 + $0x700] sm:$0xff]  ;;  %v57_v14 = vld [vmem:[#allocation3 + $0x78] sm:$0xff] }
  0x84   :  { %1971 = vmatpush3.msra.mxu1 %v313_v15  ;;  %1937 = vmatprep.subr.mxu0 %v296_v16  ;;  %v54_v13 = vld [vmem:[#allocation3 + $0x60] sm:$0xff]  ;;  %v361_v15 = vld [vmem:[#allocation6 + $0x8f8] sm:$0xff] }
  0x85   :  { %1972 = vmatprep.subr.mxu1 %v328_v17  ;;  %1938 = vmatpush3.msra.mxu0 %v280_v18  ;;  %v393_v16 = vld [vmem:[#allocation6 + $0x9f8] sm:$0xff]  ;;  %v56_v17 = vld [vmem:[#allocation3 + $0x70] sm:$0xff] }
  0x86   :  { %1973 = vmatpush3.msra.mxu1 %v312_v19  ;;  %1939 = vmatprep.subr.mxu0 %v295_v20  ;;  %v345_v18 = vld [vmem:[#allocation6 + $0x878] sm:$0xff]  ;;  %v360_v20 = vld [vmem:[#allocation6 + $0x8f0] sm:$0xff] }
  0x87   :  { %1974 = vmatprep.subr.mxu1 %v327_v21  ;;  %1940 = vmatpush3.msra.mxu0 %v279_v22  ;;  %v377_v19 = vld [vmem:[#allocation6 + $0x978] sm:$0xff]  ;;  %v392_v21 = vld [vmem:[#allocation6 + $0x9f0] sm:$0xff] }
  0x88   :  { %1975 = vmatpush3.msra.mxu1 %v311_v23  ;;  %1941 = vmatprep.subr.mxu0 %v294_v24  ;;  %v344_v22 = vld [vmem:[#allocation6 + $0x870] sm:$0xff]  ;;  %v359_v24 = vld [vmem:[#allocation6 + $0x8e8] sm:$0xff] }
  0x89   :  { %1976 = vmatprep.subr.mxu1 %v326_v25  ;;  %1942 = vmatpush3.msra.mxu0 %v278_v26  ;;  %v376_v23 = vld [vmem:[#allocation6 + $0x970] sm:$0xff]  ;;  %v391_v25 = vld [vmem:[#allocation6 + $0x9e8] sm:$0xff] }
  0x8a   :  { %1977 = vmatpush3.msra.mxu1 %v310_v27  ;;  %1943 = vmatprep.subr.mxu0 %v293_v28  ;;  %v343_v26 = vld [vmem:[#allocation6 + $0x868] sm:$0xff]  ;;  %v358_v28 = vld [vmem:[#allocation6 + $0x8e0] sm:$0xff] }
  0x8b   :  { %1978 = vmatprep.subr.mxu1 %v325_v29  ;;  %1944 = vmatpush3.msra.mxu0 %v277_v30  ;;  %v375_v27 = vld [vmem:[#allocation6 + $0x968] sm:$0xff]  ;;  %v390_v29 = vld [vmem:[#allocation6 + $0x9e0] sm:$0xff] }
  0x8c   :  { %1979 = vmatpush3.msra.mxu1 %v309_v31  ;;  %1945 = vmatprep.subr.mxu0 %v292_v32  ;;  %v342_v30 = vld [vmem:[#allocation6 + $0x860] sm:$0xff]  ;;  %v357_v32 = vld [vmem:[#allocation6 + $0x8d8] sm:$0xff] }
  0x8d   :  { %1980 = vmatprep.subr.mxu1 %v324_v33  ;;  %1946 = vmatpush3.msra.mxu0 %v276_v34  ;;  %v374_v31 = vld [vmem:[#allocation6 + $0x960] sm:$0xff]  ;;  %v389_v33 = vld [vmem:[#allocation6 + $0x9d8] sm:$0xff] }
  0x8e   :  { %1981 = vmatpush3.msra.mxu1 %v308_v35  ;;  %1947 = vmatprep.subr.mxu0 %v291_v36  ;;  %v341_v34 = vld [vmem:[#allocation6 + $0x858] sm:$0xff]  ;;  %v356_v36 = vld [vmem:[#allocation6 + $0x8d0] sm:$0xff] }
  0x8f   :  { %1982 = vmatprep.subr.mxu1 %v323_v37  ;;  %1948 = vmatpush3.msra.mxu0 %v275_v38  ;;  %v373_v35 = vld [vmem:[#allocation6 + $0x958] sm:$0xff]  ;;  %v388_v37 = vld [vmem:[#allocation6 + $0x9d0] sm:$0xff] }
  0x90   :  { %1983 = vmatpush3.msra.mxu1 %v307_v39  ;;  %1949 = vmatprep.subr.mxu0 %v290_v40  ;;  %v340_v38 = vld [vmem:[#allocation6 + $0x850] sm:$0xff]  ;;  %v355_v40 = vld [vmem:[#allocation6 + $0x8c8] sm:$0xff] }
  0x91   :  { %1984 = vmatprep.subr.mxu1 %v322_v41  ;;  %1950 = vmatpush3.msra.mxu0 %v274_v42  ;;  %v372_v39 = vld [vmem:[#allocation6 + $0x950] sm:$0xff]  ;;  %v387_v41 = vld [vmem:[#allocation6 + $0x9c8] sm:$0xff] }
  0x92   :  { %1985 = vmatpush3.msra.mxu1 %v306_v43  ;;  %1951 = vmatprep.subr.mxu0 %v289_v44  ;;  %v339_v42 = vld [vmem:[#allocation6 + $0x848] sm:$0xff]  ;;  %v354_v44 = vld [vmem:[#allocation6 + $0x8c0] sm:$0xff] }
  0x93   :  { %1986 = vmatprep.subr.mxu1 %v321_v45  ;;  %1952 = vmatpush3.msra.mxu0 %v273_v46  ;;  %v371_v43 = vld [vmem:[#allocation6 + $0x948] sm:$0xff]  ;;  %v386_v45 = vld [vmem:[#allocation6 + $0x9c0] sm:$0xff] }
  0x94   :  { %1987 = vmatpush3.msra.mxu1 %v305_v47  ;;  %1953 = vmatprep.subr.mxu0 %v288_v48  ;;  %v338_v46 = vld [vmem:[#allocation6 + $0x840] sm:$0xff]  ;;  %v353_v48 = vld [vmem:[#allocation6 + $0x8b8] sm:$0xff] }
  0x95   :  { %1988 = vmatprep.subr.mxu1 %v320_v49  ;;  %1954 = vmatpush3.msra.mxu0 %v272_v50  ;;  %v370_v47 = vld [vmem:[#allocation6 + $0x940] sm:$0xff]  ;;  %v385_v49 = vld [vmem:[#allocation6 + $0x9b8] sm:$0xff] }
  0x96   :  { %1989 = vmatpush3.msra.mxu1 %v304_v51  ;;  %1955 = vmatprep.subr.mxu0 %v287_v52  ;;  %v337_v50 = vld [vmem:[#allocation6 + $0x838] sm:$0xff]  ;;  %v352_v52 = vld [vmem:[#allocation6 + $0x8b0] sm:$0xff] }
  0x97   :  { %1990 = vmatprep.subr.mxu1 %v319_v53  ;;  %1956 = vmatpush3.msra.mxu0 %v271_v54  ;;  %v369_v51 = vld [vmem:[#allocation6 + $0x938] sm:$0xff]  ;;  %v384_v53 = vld [vmem:[#allocation6 + $0x9b0] sm:$0xff] }
  0x98   :  { %1991 = vmatpush3.msra.mxu1 %v303_v55  ;;  %1957 = vmatprep.subr.mxu0 %v286_v56  ;;  %v336_v54 = vld [vmem:[#allocation6 + $0x830] sm:$0xff]  ;;  %v351_v56 = vld [vmem:[#allocation6 + $0x8a8] sm:$0xff] }
  0x99   :  { %1992 = vmatprep.subr.mxu1 %v318_v57  ;;  %1958 = vmatpush3.msra.mxu0 %v270_v58  ;;  %v368_v55 = vld [vmem:[#allocation6 + $0x930] sm:$0xff]  ;;  %v383_v57 = vld [vmem:[#allocation6 + $0x9a8] sm:$0xff] }
  0x9a   :  { %1993 = vmatpush3.msra.mxu1 %v302_v59  ;;  %1959 = vmatprep.subr.mxu0 %v285_v60  ;;  %v335_v58 = vld [vmem:[#allocation6 + $0x828] sm:$0xff]  ;;  %v350_v60 = vld [vmem:[#allocation6 + $0x8a0] sm:$0xff] }
  0x9b   :  { %1994 = vmatprep.subr.mxu1 %v317_v61  ;;  %1960 = vmatpush3.msra.mxu0 %v269_v62  ;;  %v367_v59 = vld [vmem:[#allocation6 + $0x928] sm:$0xff]  ;;  %v382_v61 = vld [vmem:[#allocation6 + $0x9a0] sm:$0xff] }
  0x9c   :  { %1995 = vmatpush3.msra.mxu1 %v301_v63  ;;  %1961 = vmatprep.subr.mxu0 %v284_v0  ;;  %v334_v62 = vld [vmem:[#allocation6 + $0x820] sm:$0xff]  ;;  %v349_v0 = vld [vmem:[#allocation6 + $0x898] sm:$0xff] }
  0x9d   :  { %1996 = vmatprep.subr.mxu1 %v316_v1  ;;  %1962 = vmatpush3.msra.mxu0 %v268_v2  ;;  %v366_v63 = vld [vmem:[#allocation6 + $0x920] sm:$0xff]  ;;  %v381_v1 = vld [vmem:[#allocation6 + $0x998] sm:$0xff] }
  0x9e   :  { %1997 = vmatpush3.msra.mxu1 %v300_v3  ;;  %1963 = vmatprep.subr.mxu0 %v283_v4  ;;  %v333_v2 = vld [vmem:[#allocation6 + $0x818] sm:$0xff]  ;;  %v348_v4 = vld [vmem:[#allocation6 + $0x890] sm:$0xff] }
  0x9f   :  { %1998 = vmatprep.subr.mxu1 %v315_v5  ;;  %1964 = vmatpush3.msra.mxu0 %v267_v6  ;;  %v365_v3 = vld [vmem:[#allocation6 + $0x918] sm:$0xff]  ;;  %v380_v5 = vld [vmem:[#allocation6 + $0x990] sm:$0xff] }
  0xa0   :  { %1999 = vmatpush3.msra.mxu1 %v299_v7  ;;  %1965 = vmatprep.subr.mxu0 %v282_v8  ;;  %v332_v6 = vld [vmem:[#allocation6 + $0x810] sm:$0xff]  ;;  %v347_v8 = vld [vmem:[#allocation6 + $0x888] sm:$0xff] }
  0xa1   :  { %2000 = vmatprep.subr.mxu1 %v314_v9  ;;  %1966 = vmatpush3.msra.mxu0 %v266_v10  ;;  %v364_v7 = vld [vmem:[#allocation6 + $0x910] sm:$0xff]  ;;  %v379_v9 = vld [vmem:[#allocation6 + $0x988] sm:$0xff] }
  0xa2   :  { %1072 = vmatprep.mubr.f32.mxu0 %v55_v11  ;;  %2001 = vmatpush3.msra.mxu1 %v298_v12  ;;  %v331_v10 = vld [vmem:[#allocation6 + $0x808] sm:$0xff]  ;;  %v346_v12 = vld [vmem:[#allocation6 + $0x880] sm:$0xff] }
  0xa3   :  { %1073 = vmatmul.mubr.f32.vlgmr.msra.gmra.mxu0 %v54_v13  ;;  %1142 = vmatprep.mubr.f32.mxu1 %v57_v14  ;;  %v363_v11 = vld [vmem:[#allocation6 + $0x908] sm:$0xff]  ;;  %v378_v13 = vld [vmem:[#allocation6 + $0x980] sm:$0xff] }
  0xa4   :  { %2005 = vmatprep.subr.mxu0 %v361_v15  ;;  %2040 = vmatprep.subr.mxu1 %v393_v16  ;;  %v330_v14 = vld [vmem:[#allocation6 + $0x800] sm:$0xff]  ;;  %v59_v15 = vld [vmem:[#allocation3 + $0x88] sm:$0xff] }
  0xa5   :  { %1143 = vmatmul.mubr.f32.vlgmr.msra.gmra.mxu1 %v56_v17  ;;  %2006 = vmatpush3.msra.mxu0 %v345_v18  ;;  %v362_v16 = vld [vmem:[#allocation6 + $0x900] sm:$0xff]  ;;  %v61_v18 = vld [vmem:[#allocation3 + $0x98] sm:$0xff] }
  0xa6   :  { %2041 = vmatpush3.msra.mxu1 %v377_v19  ;;  %2007 = vmatprep.subr.mxu0 %v360_v20  ;;  %v58_v17 = vld [vmem:[#allocation3 + $0x80] sm:$0xff]  ;;  %v425_v19 = vld [vmem:[#allocation6 + $0xaf8] sm:$0xff] }
  0xa7   :  { %2042 = vmatprep.subr.mxu1 %v392_v21  ;;  %2008 = vmatpush3.msra.mxu0 %v344_v22  ;;  %v457_v20 = vld [vmem:[#allocation6 + $0xbf8] sm:$0xff]  ;;  %v60_v21 = vld [vmem:[#allocation3 + $0x90] sm:$0xff] }
  0xa8   :  { %2043 = vmatpush3.msra.mxu1 %v376_v23  ;;  %2009 = vmatprep.subr.mxu0 %v359_v24  ;;  %v409_v22 = vld [vmem:[#allocation6 + $0xa78] sm:$0xff]  ;;  %v424_v24 = vld [vmem:[#allocation6 + $0xaf0] sm:$0xff] }
  0xa9   :  { %2044 = vmatprep.subr.mxu1 %v391_v25  ;;  %2010 = vmatpush3.msra.mxu0 %v343_v26  ;;  %v441_v23 = vld [vmem:[#allocation6 + $0xb78] sm:$0xff]  ;;  %v456_v25 = vld [vmem:[#allocation6 + $0xbf0] sm:$0xff] }
  0xaa   :  { %2045 = vmatpush3.msra.mxu1 %v375_v27  ;;  %2011 = vmatprep.subr.mxu0 %v358_v28  ;;  %v408_v26 = vld [vmem:[#allocation6 + $0xa70] sm:$0xff]  ;;  %v423_v28 = vld [vmem:[#allocation6 + $0xae8] sm:$0xff] }
  0xab   :  { %2046 = vmatprep.subr.mxu1 %v390_v29  ;;  %2012 = vmatpush3.msra.mxu0 %v342_v30  ;;  %v440_v27 = vld [vmem:[#allocation6 + $0xb70] sm:$0xff]  ;;  %v455_v29 = vld [vmem:[#allocation6 + $0xbe8] sm:$0xff] }
  0xac   :  { %2047 = vmatpush3.msra.mxu1 %v374_v31  ;;  %2013 = vmatprep.subr.mxu0 %v357_v32  ;;  %v407_v30 = vld [vmem:[#allocation6 + $0xa68] sm:$0xff]  ;;  %v422_v32 = vld [vmem:[#allocation6 + $0xae0] sm:$0xff] }
  0xad   :  { %2048 = vmatprep.subr.mxu1 %v389_v33  ;;  %2014 = vmatpush3.msra.mxu0 %v341_v34  ;;  %v439_v31 = vld [vmem:[#allocation6 + $0xb68] sm:$0xff]  ;;  %v454_v33 = vld [vmem:[#allocation6 + $0xbe0] sm:$0xff] }
  0xae   :  { %2049 = vmatpush3.msra.mxu1 %v373_v35  ;;  %2015 = vmatprep.subr.mxu0 %v356_v36  ;;  %v406_v34 = vld [vmem:[#allocation6 + $0xa60] sm:$0xff]  ;;  %v421_v36 = vld [vmem:[#allocation6 + $0xad8] sm:$0xff] }
  0xaf   :  { %2050 = vmatprep.subr.mxu1 %v388_v37  ;;  %2016 = vmatpush3.msra.mxu0 %v340_v38  ;;  %v438_v35 = vld [vmem:[#allocation6 + $0xb60] sm:$0xff]  ;;  %v453_v37 = vld [vmem:[#allocation6 + $0xbd8] sm:$0xff] }
  0xb0   :  { %2051 = vmatpush3.msra.mxu1 %v372_v39  ;;  %2017 = vmatprep.subr.mxu0 %v355_v40  ;;  %v405_v38 = vld [vmem:[#allocation6 + $0xa58] sm:$0xff]  ;;  %v420_v40 = vld [vmem:[#allocation6 + $0xad0] sm:$0xff] }
  0xb1   :  { %2052 = vmatprep.subr.mxu1 %v387_v41  ;;  %2018 = vmatpush3.msra.mxu0 %v339_v42  ;;  %v437_v39 = vld [vmem:[#allocation6 + $0xb58] sm:$0xff]  ;;  %v452_v41 = vld [vmem:[#allocation6 + $0xbd0] sm:$0xff] }
  0xb2   :  { %2053 = vmatpush3.msra.mxu1 %v371_v43  ;;  %2019 = vmatprep.subr.mxu0 %v354_v44  ;;  %v404_v42 = vld [vmem:[#allocation6 + $0xa50] sm:$0xff]  ;;  %v419_v44 = vld [vmem:[#allocation6 + $0xac8] sm:$0xff] }
  0xb3   :  { %2054 = vmatprep.subr.mxu1 %v386_v45  ;;  %2020 = vmatpush3.msra.mxu0 %v338_v46  ;;  %v436_v43 = vld [vmem:[#allocation6 + $0xb50] sm:$0xff]  ;;  %v451_v45 = vld [vmem:[#allocation6 + $0xbc8] sm:$0xff] }
  0xb4   :  { %2055 = vmatpush3.msra.mxu1 %v370_v47  ;;  %2021 = vmatprep.subr.mxu0 %v353_v48  ;;  %v403_v46 = vld [vmem:[#allocation6 + $0xa48] sm:$0xff]  ;;  %v418_v48 = vld [vmem:[#allocation6 + $0xac0] sm:$0xff] }
  0xb5   :  { %2056 = vmatprep.subr.mxu1 %v385_v49  ;;  %2022 = vmatpush3.msra.mxu0 %v337_v50  ;;  %v435_v47 = vld [vmem:[#allocation6 + $0xb48] sm:$0xff]  ;;  %v450_v49 = vld [vmem:[#allocation6 + $0xbc0] sm:$0xff] }
  0xb6   :  { %2057 = vmatpush3.msra.mxu1 %v369_v51  ;;  %2023 = vmatprep.subr.mxu0 %v352_v52  ;;  %v402_v50 = vld [vmem:[#allocation6 + $0xa40] sm:$0xff]  ;;  %v417_v52 = vld [vmem:[#allocation6 + $0xab8] sm:$0xff] }
  0xb7   :  { %2058 = vmatprep.subr.mxu1 %v384_v53  ;;  %2024 = vmatpush3.msra.mxu0 %v336_v54  ;;  %v434_v51 = vld [vmem:[#allocation6 + $0xb40] sm:$0xff]  ;;  %v449_v53 = vld [vmem:[#allocation6 + $0xbb8] sm:$0xff] }
  0xb8   :  { %2059 = vmatpush3.msra.mxu1 %v368_v55  ;;  %2025 = vmatprep.subr.mxu0 %v351_v56  ;;  %v401_v54 = vld [vmem:[#allocation6 + $0xa38] sm:$0xff]  ;;  %v416_v56 = vld [vmem:[#allocation6 + $0xab0] sm:$0xff] }
  0xb9   :  { %2060 = vmatprep.subr.mxu1 %v383_v57  ;;  %2026 = vmatpush3.msra.mxu0 %v335_v58  ;;  %v433_v55 = vld [vmem:[#allocation6 + $0xb38] sm:$0xff]  ;;  %v448_v57 = vld [vmem:[#allocation6 + $0xbb0] sm:$0xff] }
  0xba   :  { %2061 = vmatpush3.msra.mxu1 %v367_v59  ;;  %2027 = vmatprep.subr.mxu0 %v350_v60  ;;  %v400_v58 = vld [vmem:[#allocation6 + $0xa30] sm:$0xff]  ;;  %v415_v60 = vld [vmem:[#allocation6 + $0xaa8] sm:$0xff] }
  0xbb   :  { %2062 = vmatprep.subr.mxu1 %v382_v61  ;;  %2028 = vmatpush3.msra.mxu0 %v334_v62  ;;  %v432_v59 = vld [vmem:[#allocation6 + $0xb30] sm:$0xff]  ;;  %v447_v61 = vld [vmem:[#allocation6 + $0xba8] sm:$0xff] }
  0xbc   :  { %2063 = vmatpush3.msra.mxu1 %v366_v63  ;;  %2029 = vmatprep.subr.mxu0 %v349_v0  ;;  %v399_v62 = vld [vmem:[#allocation6 + $0xa28] sm:$0xff]  ;;  %v414_v0 = vld [vmem:[#allocation6 + $0xaa0] sm:$0xff] }
  0xbd   :  { %2064 = vmatprep.subr.mxu1 %v381_v1  ;;  %2030 = vmatpush3.msra.mxu0 %v333_v2  ;;  %v431_v63 = vld [vmem:[#allocation6 + $0xb28] sm:$0xff]  ;;  %v446_v1 = vld [vmem:[#allocation6 + $0xba0] sm:$0xff] }
  0xbe   :  { %2065 = vmatpush3.msra.mxu1 %v365_v3  ;;  %2031 = vmatprep.subr.mxu0 %v348_v4  ;;  %v398_v2 = vld [vmem:[#allocation6 + $0xa20] sm:$0xff]  ;;  %v413_v4 = vld [vmem:[#allocation6 + $0xa98] sm:$0xff] }
  0xbf   :  { %2066 = vmatprep.subr.mxu1 %v380_v5  ;;  %2032 = vmatpush3.msra.mxu0 %v332_v6  ;;  %v430_v3 = vld [vmem:[#allocation6 + $0xb20] sm:$0xff]  ;;  %v445_v5 = vld [vmem:[#allocation6 + $0xb98] sm:$0xff] }
  0xc0   :  { %2067 = vmatpush3.msra.mxu1 %v364_v7  ;;  %2033 = vmatprep.subr.mxu0 %v347_v8  ;;  %v397_v6 = vld [vmem:[#allocation6 + $0xa18] sm:$0xff]  ;;  %v412_v8 = vld [vmem:[#allocation6 + $0xa90] sm:$0xff] }
  0xc1   :  { %2068 = vmatprep.subr.mxu1 %v379_v9  ;;  %2034 = vmatpush3.msra.mxu0 %v331_v10  ;;  %v429_v7 = vld [vmem:[#allocation6 + $0xb18] sm:$0xff]  ;;  %v444_v9 = vld [vmem:[#allocation6 + $0xb90] sm:$0xff] }
  0xc2   :  { %2069 = vmatpush3.msra.mxu1 %v363_v11  ;;  %2035 = vmatprep.subr.mxu0 %v346_v12  ;;  %v396_v10 = vld [vmem:[#allocation6 + $0xa10] sm:$0xff]  ;;  %v411_v12 = vld [vmem:[#allocation6 + $0xa88] sm:$0xff] }
  0xc3   :  { %2070 = vmatprep.subr.mxu1 %v378_v13  ;;  %2036 = vmatpush3.msra.mxu0 %v330_v14  ;;  %v428_v11 = vld [vmem:[#allocation6 + $0xb10] sm:$0xff]  ;;  %v443_v13 = vld [vmem:[#allocation6 + $0xb88] sm:$0xff] }
  0xc4   :  { %1212 = vmatprep.mubr.f32.mxu0 %v59_v15  ;;  %2071 = vmatpush3.msra.mxu1 %v362_v16  ;;  %v395_v14 = vld [vmem:[#allocation6 + $0xa08] sm:$0xff]  ;;  %v410_v16 = vld [vmem:[#allocation6 + $0xa80] sm:$0xff] }
  0xc5   :  { %1213 = vmatmul.mubr.f32.vlgmr.msra.gmra.mxu0 %v58_v17  ;;  %1282 = vmatprep.mubr.f32.mxu1 %v61_v18  ;;  %v427_v15 = vld [vmem:[#allocation6 + $0xb08] sm:$0xff]  ;;  %v442_v17 = vld [vmem:[#allocation6 + $0xb80] sm:$0xff] }
  0xc6   :  { %2075 = vmatprep.subr.mxu0 %v425_v19  ;;  %2110 = vmatprep.subr.mxu1 %v457_v20  ;;  %v394_v18 = vld [vmem:[#allocation6 + $0xa00] sm:$0xff]  ;;  %v63_v19 = vld [vmem:[#allocation3 + $0xa8] sm:$0xff] }
  0xc7   :  { %1283 = vmatmul.mubr.f32.vlgmr.msra.gmra.mxu1 %v60_v21  ;;  %2076 = vmatpush3.msra.mxu0 %v409_v22  ;;  %v426_v20 = vld [vmem:[#allocation6 + $0xb00] sm:$0xff]  ;;  %v65_v22 = vld [vmem:[#allocation3 + $0xb8] sm:$0xff] }
  0xc8   :  { %2111 = vmatpush3.msra.mxu1 %v441_v23  ;;  %2077 = vmatprep.subr.mxu0 %v424_v24  ;;  %v62_v21 = vld [vmem:[#allocation3 + $0xa0] sm:$0xff]  ;;  %v489_v23 = vld [vmem:[#allocation6 + $0xcf8] sm:$0xff] }
  0xc9   :  { %2112 = vmatprep.subr.mxu1 %v456_v25  ;;  %2078 = vmatpush3.msra.mxu0 %v408_v26  ;;  %v521_v24 = vld [vmem:[#allocation6 + $0xdf8] sm:$0xff]  ;;  %v64_v25 = vld [vmem:[#allocation3 + $0xb0] sm:$0xff] }
  0xca   :  { %2113 = vmatpush3.msra.mxu1 %v440_v27  ;;  %2079 = vmatprep.subr.mxu0 %v423_v28  ;;  %v473_v26 = vld [vmem:[#allocation6 + $0xc78] sm:$0xff]  ;;  %v488_v28 = vld [vmem:[#allocation6 + $0xcf0] sm:$0xff] }
  0xcb   :  { %2114 = vmatprep.subr.mxu1 %v455_v29  ;;  %2080 = vmatpush3.msra.mxu0 %v407_v30  ;;  %v505_v27 = vld [vmem:[#allocation6 + $0xd78] sm:$0xff]  ;;  %v520_v29 = vld [vmem:[#allocation6 + $0xdf0] sm:$0xff] }
  0xcc   :  { %2115 = vmatpush3.msra.mxu1 %v439_v31  ;;  %2081 = vmatprep.subr.mxu0 %v422_v32  ;;  %v472_v30 = vld [vmem:[#allocation6 + $0xc70] sm:$0xff]  ;;  %v487_v32 = vld [vmem:[#allocation6 + $0xce8] sm:$0xff] }
  0xcd   :  { %2116 = vmatprep.subr.mxu1 %v454_v33  ;;  %2082 = vmatpush3.msra.mxu0 %v406_v34  ;;  %v504_v31 = vld [vmem:[#allocation6 + $0xd70] sm:$0xff]  ;;  %v519_v33 = vld [vmem:[#allocation6 + $0xde8] sm:$0xff] }
  0xce   :  { %2117 = vmatpush3.msra.mxu1 %v438_v35  ;;  %2083 = vmatprep.subr.mxu0 %v421_v36  ;;  %v471_v34 = vld [vmem:[#allocation6 + $0xc68] sm:$0xff]  ;;  %v486_v36 = vld [vmem:[#allocation6 + $0xce0] sm:$0xff] }
  0xcf   :  { %2118 = vmatprep.subr.mxu1 %v453_v37  ;;  %2084 = vmatpush3.msra.mxu0 %v405_v38  ;;  %v503_v35 = vld [vmem:[#allocation6 + $0xd68] sm:$0xff]  ;;  %v518_v37 = vld [vmem:[#allocation6 + $0xde0] sm:$0xff] }
  0xd0   :  { %2119 = vmatpush3.msra.mxu1 %v437_v39  ;;  %2085 = vmatprep.subr.mxu0 %v420_v40  ;;  %v470_v38 = vld [vmem:[#allocation6 + $0xc60] sm:$0xff]  ;;  %v485_v40 = vld [vmem:[#allocation6 + $0xcd8] sm:$0xff] }
  0xd1   :  { %2120 = vmatprep.subr.mxu1 %v452_v41  ;;  %2086 = vmatpush3.msra.mxu0 %v404_v42  ;;  %v502_v39 = vld [vmem:[#allocation6 + $0xd60] sm:$0xff]  ;;  %v517_v41 = vld [vmem:[#allocation6 + $0xdd8] sm:$0xff] }
  0xd2   :  { %2121 = vmatpush3.msra.mxu1 %v436_v43  ;;  %2087 = vmatprep.subr.mxu0 %v419_v44  ;;  %v469_v42 = vld [vmem:[#allocation6 + $0xc58] sm:$0xff]  ;;  %v484_v44 = vld [vmem:[#allocation6 + $0xcd0] sm:$0xff] }
  0xd3   :  { %2122 = vmatprep.subr.mxu1 %v451_v45  ;;  %2088 = vmatpush3.msra.mxu0 %v403_v46  ;;  %v501_v43 = vld [vmem:[#allocation6 + $0xd58] sm:$0xff]  ;;  %v516_v45 = vld [vmem:[#allocation6 + $0xdd0] sm:$0xff] }
  0xd4   :  { %2123 = vmatpush3.msra.mxu1 %v435_v47  ;;  %2089 = vmatprep.subr.mxu0 %v418_v48  ;;  %v468_v46 = vld [vmem:[#allocation6 + $0xc50] sm:$0xff]  ;;  %v483_v48 = vld [vmem:[#allocation6 + $0xcc8] sm:$0xff] }
  0xd5   :  { %2124 = vmatprep.subr.mxu1 %v450_v49  ;;  %2090 = vmatpush3.msra.mxu0 %v402_v50  ;;  %v500_v47 = vld [vmem:[#allocation6 + $0xd50] sm:$0xff]  ;;  %v515_v49 = vld [vmem:[#allocation6 + $0xdc8] sm:$0xff] }
  0xd6   :  { %2125 = vmatpush3.msra.mxu1 %v434_v51  ;;  %2091 = vmatprep.subr.mxu0 %v417_v52  ;;  %v467_v50 = vld [vmem:[#allocation6 + $0xc48] sm:$0xff]  ;;  %v482_v52 = vld [vmem:[#allocation6 + $0xcc0] sm:$0xff] }
  0xd7   :  { %2126 = vmatprep.subr.mxu1 %v449_v53  ;;  %2092 = vmatpush3.msra.mxu0 %v401_v54  ;;  %v499_v51 = vld [vmem:[#allocation6 + $0xd48] sm:$0xff]  ;;  %v514_v53 = vld [vmem:[#allocation6 + $0xdc0] sm:$0xff] }
  0xd8   :  { %2127 = vmatpush3.msra.mxu1 %v433_v55  ;;  %2093 = vmatprep.subr.mxu0 %v416_v56  ;;  %v466_v54 = vld [vmem:[#allocation6 + $0xc40] sm:$0xff]  ;;  %v481_v56 = vld [vmem:[#allocation6 + $0xcb8] sm:$0xff] }
  0xd9   :  { %2128 = vmatprep.subr.mxu1 %v448_v57  ;;  %2094 = vmatpush3.msra.mxu0 %v400_v58  ;;  %v498_v55 = vld [vmem:[#allocation6 + $0xd40] sm:$0xff]  ;;  %v513_v57 = vld [vmem:[#allocation6 + $0xdb8] sm:$0xff] }
  0xda   :  { %2129 = vmatpush3.msra.mxu1 %v432_v59  ;;  %2095 = vmatprep.subr.mxu0 %v415_v60  ;;  %v465_v58 = vld [vmem:[#allocation6 + $0xc38] sm:$0xff]  ;;  %v480_v60 = vld [vmem:[#allocation6 + $0xcb0] sm:$0xff] }
  0xdb   :  { %2130 = vmatprep.subr.mxu1 %v447_v61  ;;  %2096 = vmatpush3.msra.mxu0 %v399_v62  ;;  %v497_v59 = vld [vmem:[#allocation6 + $0xd38] sm:$0xff]  ;;  %v512_v61 = vld [vmem:[#allocation6 + $0xdb0] sm:$0xff] }
  0xdc   :  { %2131 = vmatpush3.msra.mxu1 %v431_v63  ;;  %2097 = vmatprep.subr.mxu0 %v414_v0  ;;  %v464_v62 = vld [vmem:[#allocation6 + $0xc30] sm:$0xff]  ;;  %v479_v0 = vld [vmem:[#allocation6 + $0xca8] sm:$0xff] }
  0xdd   :  { %2132 = vmatprep.subr.mxu1 %v446_v1  ;;  %2098 = vmatpush3.msra.mxu0 %v398_v2  ;;  %v496_v63 = vld [vmem:[#allocation6 + $0xd30] sm:$0xff]  ;;  %v511_v1 = vld [vmem:[#allocation6 + $0xda8] sm:$0xff] }
  0xde   :  { %2133 = vmatpush3.msra.mxu1 %v430_v3  ;;  %2099 = vmatprep.subr.mxu0 %v413_v4  ;;  %v463_v2 = vld [vmem:[#allocation6 + $0xc28] sm:$0xff]  ;;  %v478_v4 = vld [vmem:[#allocation6 + $0xca0] sm:$0xff] }
  0xdf   :  { %2134 = vmatprep.subr.mxu1 %v445_v5  ;;  %2100 = vmatpush3.msra.mxu0 %v397_v6  ;;  %v495_v3 = vld [vmem:[#allocation6 + $0xd28] sm:$0xff]  ;;  %v510_v5 = vld [vmem:[#allocation6 + $0xda0] sm:$0xff] }
  0xe0   :  { %2135 = vmatpush3.msra.mxu1 %v429_v7  ;;  %2101 = vmatprep.subr.mxu0 %v412_v8  ;;  %v462_v6 = vld [vmem:[#allocation6 + $0xc20] sm:$0xff]  ;;  %v477_v8 = vld [vmem:[#allocation6 + $0xc98] sm:$0xff] }
  0xe1   :  { %2136 = vmatprep.subr.mxu1 %v444_v9  ;;  %2102 = vmatpush3.msra.mxu0 %v396_v10  ;;  %v494_v7 = vld [vmem:[#allocation6 + $0xd20] sm:$0xff]  ;;  %v509_v9 = vld [vmem:[#allocation6 + $0xd98] sm:$0xff] }
  0xe2   :  { %2137 = vmatpush3.msra.mxu1 %v428_v11  ;;  %2103 = vmatprep.subr.mxu0 %v411_v12  ;;  %v461_v10 = vld [vmem:[#allocation6 + $0xc18] sm:$0xff]  ;;  %v476_v12 = vld [vmem:[#allocation6 + $0xc90] sm:$0xff] }
  0xe3   :  { %2138 = vmatprep.subr.mxu1 %v443_v13  ;;  %2104 = vmatpush3.msra.mxu0 %v395_v14  ;;  %v493_v11 = vld [vmem:[#allocation6 + $0xd18] sm:$0xff]  ;;  %v508_v13 = vld [vmem:[#allocation6 + $0xd90] sm:$0xff] }
  0xe4   :  { %2139 = vmatpush3.msra.mxu1 %v427_v15  ;;  %2105 = vmatprep.subr.mxu0 %v410_v16  ;;  %v460_v14 = vld [vmem:[#allocation6 + $0xc10] sm:$0xff]  ;;  %v475_v16 = vld [vmem:[#allocation6 + $0xc88] sm:$0xff] }
  0xe5   :  { %2140 = vmatprep.subr.mxu1 %v442_v17  ;;  %2106 = vmatpush3.msra.mxu0 %v394_v18  ;;  %v492_v15 = vld [vmem:[#allocation6 + $0xd10] sm:$0xff]  ;;  %v507_v17 = vld [vmem:[#allocation6 + $0xd88] sm:$0xff] }
  0xe6   :  { %1352 = vmatprep.mubr.f32.mxu0 %v63_v19  ;;  %2141 = vmatpush3.msra.mxu1 %v426_v20  ;;  %v459_v18 = vld [vmem:[#allocation6 + $0xc08] sm:$0xff]  ;;  %v474_v20 = vld [vmem:[#allocation6 + $0xc80] sm:$0xff] }
  0xe7   :  { %1353 = vmatmul.mubr.f32.vlgmr.msra.gmra.mxu0 %v62_v21  ;;  %1422 = vmatprep.mubr.f32.mxu1 %v65_v22  ;;  %v491_v19 = vld [vmem:[#allocation6 + $0xd08] sm:$0xff]  ;;  %v506_v21 = vld [vmem:[#allocation6 + $0xd80] sm:$0xff] }
  0xe8   :  { %2145 = vmatprep.subr.mxu0 %v489_v23  ;;  %2180 = vmatprep.subr.mxu1 %v521_v24  ;;  %v458_v22 = vld [vmem:[#allocation6 + $0xc00] sm:$0xff]  ;;  %v67_v23 = vld [vmem:[#allocation3 + $0xc8] sm:$0xff] }
  0xe9   :  { %1423 = vmatmul.mubr.f32.vlgmr.msra.gmra.mxu1 %v64_v25  ;;  %2146 = vmatpush3.msra.mxu0 %v473_v26  ;;  %v490_v24 = vld [vmem:[#allocation6 + $0xd00] sm:$0xff]  ;;  %v69_v26 = vld [vmem:[#allocation3 + $0xd8] sm:$0xff] }
  0xea   :  { %2181 = vmatpush3.msra.mxu1 %v505_v27  ;;  %2147 = vmatprep.subr.mxu0 %v488_v28  ;;  %v66_v25 = vld [vmem:[#allocation3 + $0xc0] sm:$0xff]  ;;  %v553_v27 = vld [vmem:[#allocation6 + $0xef8] sm:$0xff] }
  0xeb   :  { %2182 = vmatprep.subr.mxu1 %v520_v29  ;;  %2148 = vmatpush3.msra.mxu0 %v472_v30  ;;  %v585_v28 = vld [vmem:[#allocation6 + $0xff8] sm:$0xff]  ;;  %v68_v29 = vld [vmem:[#allocation3 + $0xd0] sm:$0xff] }
  0xec   :  { %2183 = vmatpush3.msra.mxu1 %v504_v31  ;;  %2149 = vmatprep.subr.mxu0 %v487_v32  ;;  %v537_v30 = vld [vmem:[#allocation6 + $0xe78] sm:$0xff]  ;;  %v552_v32 = vld [vmem:[#allocation6 + $0xef0] sm:$0xff] }
  0xed   :  { %2184 = vmatprep.subr.mxu1 %v519_v33  ;;  %2150 = vmatpush3.msra.mxu0 %v471_v34  ;;  %v569_v31 = vld [vmem:[#allocation6 + $0xf78] sm:$0xff]  ;;  %v584_v33 = vld [vmem:[#allocation6 + $0xff0] sm:$0xff] }
  0xee   :  { %2185 = vmatpush3.msra.mxu1 %v503_v35  ;;  %2151 = vmatprep.subr.mxu0 %v486_v36  ;;  %v536_v34 = vld [vmem:[#allocation6 + $0xe70] sm:$0xff]  ;;  %v551_v36 = vld [vmem:[#allocation6 + $0xee8] sm:$0xff] }
  0xef   :  { %2186 = vmatprep.subr.mxu1 %v518_v37  ;;  %2152 = vmatpush3.msra.mxu0 %v470_v38  ;;  %v568_v35 = vld [vmem:[#allocation6 + $0xf70] sm:$0xff]  ;;  %v583_v37 = vld [vmem:[#allocation6 + $0xfe8] sm:$0xff] }
  0xf0   :  { %2187 = vmatpush3.msra.mxu1 %v502_v39  ;;  %2153 = vmatprep.subr.mxu0 %v485_v40  ;;  %v535_v38 = vld [vmem:[#allocation6 + $0xe68] sm:$0xff]  ;;  %v550_v40 = vld [vmem:[#allocation6 + $0xee0] sm:$0xff] }
  0xf1   :  { %2188 = vmatprep.subr.mxu1 %v517_v41  ;;  %2154 = vmatpush3.msra.mxu0 %v469_v42  ;;  %v567_v39 = vld [vmem:[#allocation6 + $0xf68] sm:$0xff]  ;;  %v582_v41 = vld [vmem:[#allocation6 + $0xfe0] sm:$0xff] }
  0xf2   :  { %2189 = vmatpush3.msra.mxu1 %v501_v43  ;;  %2155 = vmatprep.subr.mxu0 %v484_v44  ;;  %v534_v42 = vld [vmem:[#allocation6 + $0xe60] sm:$0xff]  ;;  %v549_v44 = vld [vmem:[#allocation6 + $0xed8] sm:$0xff] }
  0xf3   :  { %2190 = vmatprep.subr.mxu1 %v516_v45  ;;  %2156 = vmatpush3.msra.mxu0 %v468_v46  ;;  %v566_v43 = vld [vmem:[#allocation6 + $0xf60] sm:$0xff]  ;;  %v581_v45 = vld [vmem:[#allocation6 + $0xfd8] sm:$0xff] }
  0xf4   :  { %2191 = vmatpush3.msra.mxu1 %v500_v47  ;;  %2157 = vmatprep.subr.mxu0 %v483_v48  ;;  %v533_v46 = vld [vmem:[#allocation6 + $0xe58] sm:$0xff]  ;;  %v548_v48 = vld [vmem:[#allocation6 + $0xed0] sm:$0xff] }
  0xf5   :  { %2192 = vmatprep.subr.mxu1 %v515_v49  ;;  %2158 = vmatpush3.msra.mxu0 %v467_v50  ;;  %v565_v47 = vld [vmem:[#allocation6 + $0xf58] sm:$0xff]  ;;  %v580_v49 = vld [vmem:[#allocation6 + $0xfd0] sm:$0xff] }
  0xf6   :  { %2193 = vmatpush3.msra.mxu1 %v499_v51  ;;  %2159 = vmatprep.subr.mxu0 %v482_v52  ;;  %v532_v50 = vld [vmem:[#allocation6 + $0xe50] sm:$0xff]  ;;  %v547_v52 = vld [vmem:[#allocation6 + $0xec8] sm:$0xff] }
  0xf7   :  { %2194 = vmatprep.subr.mxu1 %v514_v53  ;;  %2160 = vmatpush3.msra.mxu0 %v466_v54  ;;  %v564_v51 = vld [vmem:[#allocation6 + $0xf50] sm:$0xff]  ;;  %v579_v53 = vld [vmem:[#allocation6 + $0xfc8] sm:$0xff] }
  0xf8   :  { %2195 = vmatpush3.msra.mxu1 %v498_v55  ;;  %2161 = vmatprep.subr.mxu0 %v481_v56  ;;  %v531_v54 = vld [vmem:[#allocation6 + $0xe48] sm:$0xff]  ;;  %v546_v56 = vld [vmem:[#allocation6 + $0xec0] sm:$0xff] }
  0xf9   :  { %2196 = vmatprep.subr.mxu1 %v513_v57  ;;  %2162 = vmatpush3.msra.mxu0 %v465_v58  ;;  %v563_v55 = vld [vmem:[#allocation6 + $0xf48] sm:$0xff]  ;;  %v578_v57 = vld [vmem:[#allocation6 + $0xfc0] sm:$0xff] }
  0xfa   :  { %2197 = vmatpush3.msra.mxu1 %v497_v59  ;;  %2163 = vmatprep.subr.mxu0 %v480_v60  ;;  %v530_v58 = vld [vmem:[#allocation6 + $0xe40] sm:$0xff]  ;;  %v545_v60 = vld [vmem:[#allocation6 + $0xeb8] sm:$0xff] }
  0xfb   :  { %2198 = vmatprep.subr.mxu1 %v512_v61  ;;  %2164 = vmatpush3.msra.mxu0 %v464_v62  ;;  %v562_v59 = vld [vmem:[#allocation6 + $0xf40] sm:$0xff]  ;;  %v577_v61 = vld [vmem:[#allocation6 + $0xfb8] sm:$0xff] }
  0xfc   :  { %2199 = vmatpush3.msra.mxu1 %v496_v63  ;;  %2165 = vmatprep.subr.mxu0 %v479_v0  ;;  %v529_v62 = vld [vmem:[#allocation6 + $0xe38] sm:$0xff]  ;;  %v544_v0 = vld [vmem:[#allocation6 + $0xeb0] sm:$0xff] }
  0xfd   :  { %2200 = vmatprep.subr.mxu1 %v511_v1  ;;  %2166 = vmatpush3.msra.mxu0 %v463_v2  ;;  %v561_v63 = vld [vmem:[#allocation6 + $0xf38] sm:$0xff]  ;;  %v576_v1 = vld [vmem:[#allocation6 + $0xfb0] sm:$0xff] }
  0xfe   :  { %2201 = vmatpush3.msra.mxu1 %v495_v3  ;;  %2167 = vmatprep.subr.mxu0 %v478_v4  ;;  %v528_v2 = vld [vmem:[#allocation6 + $0xe30] sm:$0xff]  ;;  %v543_v4 = vld [vmem:[#allocation6 + $0xea8] sm:$0xff] }
  0xff   :  { %2202 = vmatprep.subr.mxu1 %v510_v5  ;;  %2168 = vmatpush3.msra.mxu0 %v462_v6  ;;  %v560_v3 = vld [vmem:[#allocation6 + $0xf30] sm:$0xff]  ;;  %v575_v5 = vld [vmem:[#allocation6 + $0xfa8] sm:$0xff] }
 0x100   :  { %2203 = vmatpush3.msra.mxu1 %v494_v7  ;;  %2169 = vmatprep.subr.mxu0 %v477_v8  ;;  %v527_v6 = vld [vmem:[#allocation6 + $0xe28] sm:$0xff]  ;;  %v542_v8 = vld [vmem:[#allocation6 + $0xea0] sm:$0xff] }
 0x101   :  { %2204 = vmatprep.subr.mxu1 %v509_v9  ;;  %2170 = vmatpush3.msra.mxu0 %v461_v10  ;;  %v559_v7 = vld [vmem:[#allocation6 + $0xf28] sm:$0xff]  ;;  %v574_v9 = vld [vmem:[#allocation6 + $0xfa0] sm:$0xff] }
 0x102   :  { %2205 = vmatpush3.msra.mxu1 %v493_v11  ;;  %2171 = vmatprep.subr.mxu0 %v476_v12  ;;  %v526_v10 = vld [vmem:[#allocation6 + $0xe20] sm:$0xff]  ;;  %v541_v12 = vld [vmem:[#allocation6 + $0xe98] sm:$0xff] }
 0x103   :  { %2206 = vmatprep.subr.mxu1 %v508_v13  ;;  %2172 = vmatpush3.msra.mxu0 %v460_v14  ;;  %v558_v11 = vld [vmem:[#allocation6 + $0xf20] sm:$0xff]  ;;  %v573_v13 = vld [vmem:[#allocation6 + $0xf98] sm:$0xff] }
 0x104   :  { %2207 = vmatpush3.msra.mxu1 %v492_v15  ;;  %2173 = vmatprep.subr.mxu0 %v475_v16  ;;  %v525_v14 = vld [vmem:[#allocation6 + $0xe18] sm:$0xff]  ;;  %v540_v16 = vld [vmem:[#allocation6 + $0xe90] sm:$0xff] }
 0x105   :  { %2208 = vmatprep.subr.mxu1 %v507_v17  ;;  %2174 = vmatpush3.msra.mxu0 %v459_v18  ;;  %v557_v15 = vld [vmem:[#allocation6 + $0xf18] sm:$0xff]  ;;  %v572_v17 = vld [vmem:[#allocation6 + $0xf90] sm:$0xff] }
 0x106   :  { %2209 = vmatpush3.msra.mxu1 %v491_v19  ;;  %2175 = vmatprep.subr.mxu0 %v474_v20  ;;  %v524_v18 = vld [vmem:[#allocation6 + $0xe10] sm:$0xff]  ;;  %v539_v20 = vld [vmem:[#allocation6 + $0xe88] sm:$0xff] }
 0x107   :  { %2210 = vmatprep.subr.mxu1 %v506_v21  ;;  %2176 = vmatpush3.msra.mxu0 %v458_v22  ;;  %v556_v19 = vld [vmem:[#allocation6 + $0xf10] sm:$0xff]  ;;  %v571_v21 = vld [vmem:[#allocation6 + $0xf88] sm:$0xff] }
 0x108   :  { %1492 = vmatprep.mubr.f32.mxu0 %v67_v23  ;;  %2211 = vmatpush3.msra.mxu1 %v490_v24  ;;  %v523_v22 = vld [vmem:[#allocation6 + $0xe08] sm:$0xff]  ;;  %v538_v24 = vld [vmem:[#allocation6 + $0xe80] sm:$0xff] }
 0x109   :  { %1493 = vmatmul.mubr.f32.vlgmr.msra.gmra.mxu0 %v66_v25  ;;  %1562 = vmatprep.mubr.f32.mxu1 %v69_v26  ;;  %v555_v23 = vld [vmem:[#allocation6 + $0xf08] sm:$0xff]  ;;  %v570_v25 = vld [vmem:[#allocation6 + $0xf80] sm:$0xff] }
 0x10a   :  { %2215 = vmatprep.subr.mxu0 %v553_v27  ;;  %2250 = vmatprep.subr.mxu1 %v585_v28  ;;  %v522_v26 = vld [vmem:[#allocation6 + $0xe00] sm:$0xff]  ;;  %v71_v27 = vld [vmem:[#allocation3 + $0xe8] sm:$0xff] }
 0x10b   :  { %1563 = vmatmul.mubr.f32.vlgmr.msra.gmra.mxu1 %v68_v29  ;;  %2216 = vmatpush3.msra.mxu0 %v537_v30  ;;  %v554_v28 = vld [vmem:[#allocation6 + $0xf00] sm:$0xff]  ;;  %v73_v29 = vld [vmem:[#allocation3 + $0xf8] sm:$0xff] }
 0x10c   :  { %2251 = vmatpush3.msra.mxu1 %v569_v31  ;;  %2217 = vmatprep.subr.mxu0 %v552_v32  ;;  %v70_v30 = vld [vmem:[#allocation3 + $0xe0] sm:$0xff]  ;;  %v72_v31 = vld [vmem:[#allocation3 + $0xf0] sm:$0xff]  ;;  %v1757_v32 = vpop.f32.mrf.mxu0 }
 0x10d   :  { %2252 = vmatprep.subr.mxu1 %v584_v33  ;;  %2218 = vmatpush3.msra.mxu0 %v536_v34  ;;  %v1792_v33 = vpop.f32.mrf.mxu1 }
 0x10e   :  { %2253 = vmatpush3.msra.mxu1 %v568_v35  ;;  %2219 = vmatprep.subr.mxu0 %v551_v36  ;;  %v1758_v34 = vpop.f32.mrf.mxu0 }
 0x10f   :  { %2254 = vmatprep.subr.mxu1 %v583_v37  ;;  %2220 = vmatpush3.msra.mxu0 %v535_v38  ;;  %v1759_v36 = vadd.f32 %v1758_v34, %v1757_v32  ;;  %v587_v37 = vstv %s2395_s2  ;;  %v1793_v38 = vpop.f32.mrf.mxu1  ;;  %s2360_s2 = smov [#allocation8]  }
 0x110   :  { %2255 = vmatpush3.msra.mxu1 %v567_v39  ;;  %2221 = vmatprep.subr.mxu0 %v550_v40  ;;  %s1715_s24 = sshll.u32 %s2360_s2, 4  ;;  %s1716_s24 = int_to_ptr.vmem [resolvable:$true] %s1715_s24 }
 0x111   :  { %2256 = vmatprep.subr.mxu1 %v582_v41  ;;  %2222 = vmatpush3.msra.mxu0 %v534_v42  ;;  %v655_v41 = vadd.f32 %v1759_v36, %v587_v37  ;;  %v1794_v42 = vadd.f32 %v1793_v38, %v1792_v33  ;;  %s2330_s25 = scalar_lea.vmem %s1716_s24, 128  ;;  %p2335_p11 = scmp.lt.s32.totalorder %s1716_s24, %s1716_s24 }
 0x112   :  { %2257 = vmatpush3.msra.mxu1 %v566_v43  ;;  %2223 = vmatprep.subr.mxu0 %v549_v44  ;;  %p2331_p10 = scmp.ne.s32.totalorder %s1716_s24, %s2330_s25  ;;  %p2336_p12 = scmp.lt.s32.totalorder %s2330_s25, %s2330_s25 }
 0x113   :  { %2258 = vmatprep.subr.mxu1 %v581_v45  ;;  %2224 = vmatpush3.msra.mxu0 %v533_v46  ;;  %v725_v46 = vadd.f32 %v1794_v42, %v655_v41 }
 0x114   :  { %2259 = vmatpush3.msra.mxu1 %v565_v47  ;;  %2225 = vmatprep.subr.mxu0 %v548_v48  ;;  %p2337_p13 = por %p2336_p12, %p2335_p11 }
 0x115   :  { %2260 = vmatprep.subr.mxu1 %v580_v49  ;;  %2226 = vmatpush3.msra.mxu0 %v532_v50 }
 0x116   :  { %2261 = vmatpush3.msra.mxu1 %v564_v51  ;;  %2227 = vmatprep.subr.mxu0 %v547_v52  ;;  %p2338_p0 = pnand %p2337_p13, %p2331_p10 }
 0x117   :  { %2262 = vmatprep.subr.mxu1 %v579_v53  ;;  %2228 = vmatpush3.msra.mxu0 %v531_v54 }
 0x118   :  { %2263 = vmatpush3.msra.mxu1 %v563_v55  ;;  %2229 = vmatprep.subr.mxu0 %v546_v56 }
 0x119   :  { %2264 = vmatprep.subr.mxu1 %v578_v57  ;;  %2230 = vmatpush3.msra.mxu0 %v530_v58 }
 0x11a   :  { %2265 = vmatpush3.msra.mxu1 %v562_v59  ;;  %2231 = vmatprep.subr.mxu0 %v545_v60 }
 0x11b   :  { %2266 = vmatprep.subr.mxu1 %v577_v61  ;;  %2232 = vmatpush3.msra.mxu0 %v529_v62 }
 0x11c   :  { %2267 = vmatpush3.msra.mxu1 %v561_v63  ;;  %2233 = vmatprep.subr.mxu0 %v544_v0 }
 0x11d   :  { %2268 = vmatprep.subr.mxu1 %v576_v1  ;;  %2234 = vmatpush3.msra.mxu0 %v528_v2 }
 0x11e   :  { %2269 = vmatpush3.msra.mxu1 %v560_v3  ;;  %2235 = vmatprep.subr.mxu0 %v543_v4 }
 0x11f   :  { %2270 = vmatprep.subr.mxu1 %v575_v5  ;;  %2236 = vmatpush3.msra.mxu0 %v527_v6  ;;  %v1827_v35 = vpop.f32.mrf.mxu0 }
 0x120   :  { %2271 = vmatpush3.msra.mxu1 %v559_v7  ;;  %2237 = vmatprep.subr.mxu0 %v542_v8 }
 0x121   :  { %2272 = vmatprep.subr.mxu1 %v574_v9  ;;  %2238 = vmatpush3.msra.mxu0 %v526_v10  ;;  %v1862_v39 = vpop.f32.mrf.mxu1  ;;  %v1828_v40 = vpop.f32.mrf.mxu0 }
 0x122   :  { %2273 = vmatpush3.msra.mxu1 %v558_v11  ;;  %2239 = vmatprep.subr.mxu0 %v541_v12  ;;  %v1829_v44 = vadd.f32 %v1828_v40, %v1827_v35 }
 0x123   :  { %2274 = vmatprep.subr.mxu1 %v573_v13  ;;  %2240 = vmatpush3.msra.mxu0 %v525_v14  ;;  %v1863_v45 = vpop.f32.mrf.mxu1 }
 0x124   :  { %2275 = vmatpush3.msra.mxu1 %v557_v15  ;;  %2241 = vmatprep.subr.mxu0 %v540_v16  ;;  %v795_v49 = vadd.f32 %v1829_v44, %v725_v46  ;;  %v1864_v50 = vadd.f32 %v1863_v45, %v1862_v39 }
 0x125   :  { %2276 = vmatprep.subr.mxu1 %v572_v17  ;;  %2242 = vmatpush3.msra.mxu0 %v524_v18 }
 0x126   :  { %2277 = vmatpush3.msra.mxu1 %v556_v19  ;;  %2243 = vmatprep.subr.mxu0 %v539_v20  ;;  %v865_v54 = vadd.f32 %v1864_v50, %v795_v49 }
 0x127   :  { %2278 = vmatprep.subr.mxu1 %v571_v21  ;;  %2244 = vmatpush3.msra.mxu0 %v523_v22 }
 0x128   :  { %2279 = vmatpush3.msra.mxu1 %v555_v23  ;;  %2245 = vmatprep.subr.mxu0 %v538_v24 }
 0x129   :  { %2280 = vmatprep.subr.mxu1 %v570_v25  ;;  %2246 = vmatpush3.msra.mxu0 %v522_v26 }
 0x12a   :  { %1632 = vmatprep.mubr.f32.mxu0 %v71_v27  ;;  %2281 = vmatpush3.msra.mxu1 %v554_v28 }
 0x12b   :  { %1702 = vmatprep.mubr.f32.mxu1 %v73_v29  ;;  %1633 = vmatmul.mubr.f32.vlgmr.msra.gmra.mxu0 %v70_v30 }
 0x12c   :  { %1703 = vmatmul.mubr.f32.vlgmr.msra.gmra.mxu1 %v72_v31 }
 0x141   :  { %v1897_v43 = vpop.f32.mrf.mxu0 }
 0x143   :  { %v1932_v47 = vpop.f32.mrf.mxu1  ;;  %v1898_v48 = vpop.f32.mrf.mxu0 }
 0x144   :  { %v1899_v52 = vadd.f32 %v1898_v48, %v1897_v43 }
 0x145   :  { %v1933_v53 = vpop.f32.mrf.mxu1 }
 0x146   :  { %v935_v57 = vadd.f32 %v1899_v52, %v865_v54  ;;  %v1934_v58 = vadd.f32 %v1933_v53, %v1932_v47 }
 0x148   :  { %v1005_v62 = vadd.f32 %v1934_v58, %v935_v57 }
 0x163   :  { %v1967_v51 = vpop.f32.mrf.mxu0 }
 0x165   :  { %v2002_v55 = vpop.f32.mrf.mxu1  ;;  %v1968_v56 = vpop.f32.mrf.mxu0 }
 0x166   :  { %v1969_v60 = vadd.f32 %v1968_v56, %v1967_v51 }
 0x167   :  { %v2003_v61 = vpop.f32.mrf.mxu1 }
 0x168   :  { %v1075_v1 = vadd.f32 %v1969_v60, %v1005_v62  ;;  %v2004_v2 = vadd.f32 %v2003_v61, %v2002_v55 }
 0x16a   :  { %v1145_v6 = vadd.f32 %v2004_v2, %v1075_v1 }
 0x185   :  { %v2037_v59 = vpop.f32.mrf.mxu0 }
 0x187   :  { %v2072_v63 = vpop.f32.mrf.mxu1  ;;  %v2038_v0 = vpop.f32.mrf.mxu0 }
 0x188   :  { %v2039_v4 = vadd.f32 %v2038_v0, %v2037_v59 }
 0x189   :  { %v2073_v5 = vpop.f32.mrf.mxu1 }
 0x18a   :  { %v1215_v9 = vadd.f32 %v2039_v4, %v1145_v6  ;;  %v2074_v10 = vadd.f32 %v2073_v5, %v2072_v63 }
 0x18c   :  { %v1285_v14 = vadd.f32 %v2074_v10, %v1215_v9 }
 0x1a7   :  { %v2107_v3 = vpop.f32.mrf.mxu0 }
 0x1a9   :  { %v2142_v7 = vpop.f32.mrf.mxu1  ;;  %v2108_v8 = vpop.f32.mrf.mxu0 }
 0x1aa   :  { %v2109_v12 = vadd.f32 %v2108_v8, %v2107_v3 }
 0x1ab   :  { %v2143_v13 = vpop.f32.mrf.mxu1 }
 0x1ac   :  { %v1355_v17 = vadd.f32 %v2109_v12, %v1285_v14  ;;  %v2144_v18 = vadd.f32 %v2143_v13, %v2142_v7 }
 0x1ae   :  { %v1425_v21 = vadd.f32 %v2144_v18, %v1355_v17 }
 0x1c9   :  { %v2177_v11 = vpop.f32.mrf.mxu0 }
 0x1cb   :  { %v2212_v15 = vpop.f32.mrf.mxu1  ;;  %v2178_v16 = vpop.f32.mrf.mxu0 }
 0x1cc   :  { %v2179_v19 = vadd.f32 %v2178_v16, %v2177_v11 }
 0x1cd   :  { %v2213_v20 = vpop.f32.mrf.mxu1 }
 0x1ce   :  { %v1495_v22 = vadd.f32 %v2179_v19, %v1425_v21  ;;  %v2214_v23 = vadd.f32 %v2213_v20, %v2212_v15 }
 0x1d0   :  { %v1565_v28 = vadd.f32 %v2214_v23, %v1495_v22 }
 0x1eb   :  { %v2247_v24 = vpop.f32.mrf.mxu0 }
 0x1ec   :  { %v2282_v25 = vpop.f32.mrf.mxu1 }
 0x1ed   :  { %v2248_v26 = vpop.f32.mrf.mxu0 }
 0x1ee   :  { %v2283_v27 = vpop.f32.mrf.mxu1  ;;  %v2249_v29 = vadd.f32 %v2248_v26, %v2247_v24 }
 0x1ef   :  { %v2284_v31 = vadd.f32 %v2283_v27, %v2282_v25 }
 0x1f0   :  { %v1635_v30 = vadd.f32 %v2249_v29, %v1565_v28 }
 0x1f2   :  { %v1705_v32 = vadd.f32 %v2284_v31, %v1635_v30 }
 0x1f4   :  { %1708 = vst [vmem:[#allocation8] sm:$0xff] %v1705_v32 }
 0x1f5   :  { %2341 = shalt.err (!%p2338_p0)
}
 0x1f6   :  { %1718 = dma.vmem_to_hbm [thread:$0]  %s1716_s24, 128, %s2396_s3, [#allocation5]  }
 0x1f7   :  { %2354 = dma.done.wait [#allocation5], 128  }
 0x1f8   :  { %2355 = vsyncadd [#allocation5], 4294967168 }
 0x1f9   :  { %1722 = vsyncpa [#allocation4], 1 }
 0x1fa   :  { %1723 = vsyncpa [#allocation7], 1 }
 0x1fb   :  { %1724 = vsyncpa [#allocation5], 1 }

</bundles_post_ra>
